<compile_context>
chip_gen: v7x
topology: tpu7x:2x2x1
jax: 0.10.0
libtpu: 0.0.40
codegen_flags: <defaults>
</compile_context>

<pallas_src>
import jax
import jax.numpy as jnp
from jax.experimental import pallas as pl
from jax.experimental.pallas import tpu as pltpu

EPS = 1e-5

D_IN = 1024
D1 = 512
D2 = 128
D_OUT = 57
D_OUT_PAD = 128                       # lane-dense padded output width
W_PACK_ROWS = D1 + D2                 # 640 rows: [w2 ; w34_padded]
SB_PACK = D1 + D1 + D2 + D_OUT_PAD    # 512(scale) + 512(b1) + 128(b2) + 128(b34) = 1280


def _rh1_kernel(x_ref, w1q_ref, wpack_ref, sb_ref, out_ref):
    # Static, lane-aligned slices of the packed scale/bias vector (1, 1280).
    s1 = sb_ref[:, 0:D1]                        # (1, 512) w1 dequant scales
    b1 = sb_ref[:, D1:2 * D1]                   # (1, 512)
    b2 = sb_ref[:, 2 * D1:2 * D1 + D2]          # (1, 128)
    b34 = sb_ref[:, 2 * D1 + D2:SB_PACK]        # (1, 128), zero-padded past 57

    # dense1: int8 weights dequantized on the VPU (|q| <= 127 is exact in bf16),
    # bf16 MXU matmul, f32 accumulate, per-channel scale applied after the
    # accumulate (exact; BN eps semantics untouched).  BN1 affine is folded
    # into w2/b2 in the wrapper, so only the data-dependent normalize remains.
    w1f = w1q_ref[...].astype(jnp.float32).astype(jnp.bfloat16)
    h = jnp.dot(x_ref[...].astype(jnp.bfloat16), w1f,
                preferred_element_type=jnp.float32) * s1 + b1
    h = jnp.maximum(h, 0.0)
    mean = jnp.mean(h, axis=0, keepdims=True)
    ex2 = jnp.mean(h * h, axis=0, keepdims=True)
    var = jnp.maximum(ex2 - mean * mean, 0.0)
    h = (h - mean) * jax.lax.rsqrt(var + EPS)

    # dense2 (+ folded bn1 affine) + relu + bn2 statistics (affine folded ahead)
    h = jnp.dot(h.astype(jnp.bfloat16), wpack_ref[0:D1, :],
                preferred_element_type=jnp.float32) + b2
    h = jnp.maximum(h, 0.0)
    mean = jnp.mean(h, axis=0, keepdims=True)
    ex2 = jnp.mean(h * h, axis=0, keepdims=True)
    var = jnp.maximum(ex2 - mean * mean, 0.0)
    h = (h - mean) * jax.lax.rsqrt(var + EPS)

    # fused dense3·dense4 (+ folded bn2 affine), 128-lane padded output
    out_ref[...] = (jnp.dot(h.astype(jnp.bfloat16), wpack_ref[D1:W_PACK_ROWS, :],
                            preferred_element_type=jnp.float32) + b34
                    ).astype(out_ref.dtype)


def rh1_forward(x, folded_params):
    """x: (B, 1024) f32.  folded_params: (w1q_int8, wpack_bf16, scale_bias_f32)."""
    B = x.shape[0]
    w1q, wpack, sb = folded_params

    flops = 2 * B * (D_IN * D1 + D1 * D2 + D2 * D_OUT_PAD)
    bytes_accessed = (x.size * x.dtype.itemsize + w1q.size * 1 + wpack.size * 2
                      + sb.size * 4 + B * D_OUT_PAD * 4)
    cost = pl.CostEstimate(flops=flops,
                           transcendentals=D1 + D2,
                           bytes_accessed=bytes_accessed)

    vmem = pl.BlockSpec(memory_space=pltpu.MemorySpace.VMEM)
    out_padded = pl.pallas_call(
        _rh1_kernel,
        out_shape=jax.ShapeDtypeStruct((B, D_OUT_PAD), jnp.float32),
        in_specs=[vmem] * 4,
        out_specs=vmem,
        cost_estimate=cost,
    )(x, w1q, wpack, sb)
    # TODO(synk): if downstream tolerates the 128-wide padded slab, return
    # out_padded directly and drop this non-lane-aligned slice copy.
    return out_padded[:, :D_OUT]


# ---------------------------------------------------------------------------
# Parameter construction (matches PyTorch defaults) and algebraic folding.
# ---------------------------------------------------------------------------
def init_params(key):
    """nn.Linear default init: U(-1/sqrt(in), 1/sqrt(in)); BN gamma=1, beta=0."""
    def linear(key, fan_in, fan_out):
        kw, kb = jax.random.split(key)
        bound = 1.0 / jnp.sqrt(jnp.float32(fan_in))
        w = jax.random.uniform(kw, (fan_in, fan_out), jnp.float32, -bound, bound)
        b = jax.random.uniform(kb, (1, fan_out), jnp.float32, -bound, bound)
        return w, b

    k1, k2, k3, k4 = jax.random.split(key, 4)
    w1, b1 = linear(k1, D_IN, D1)
    w2, b2 = linear(k2, D1, D2)
    w3, b3 = linear(k3, D2, 64)
    w4, b4 = linear(k4, 64, D_OUT)   # TODO(synk): module says Linear(128,57); corrected to in=64
    g1 = jnp.ones((1, D1), jnp.float32)
    be1 = jnp.zeros((1, D1), jnp.float32)
    g2 = jnp.ones((1, D2), jnp.float32)   # TODO(synk): module says BatchNorm1d(512); corrected to 128
    be2 = jnp.zeros((1, D2), jnp.float32)
    return (w1, b1, g1, be1, w2, b2, g2, be2, w3, b3, w4, b4)


def fold_params(raw):
    """Algebraic folding + quantization:
       * bn1/bn2 affines folded into the following layer's weights/bias,
       * dense3·dense4 fused into one (128, 128)-padded matmul,
       * w1 quantized to int8 with per-output-channel scales,
       * w2/w34 packed into one (640,128) bf16 array,
       * scales + biases packed into one lane-aligned (1,1280) f32 array."""
    (w1, b1, g1, be1, w2, b2, g2, be2, w3, b3, w4, b4) = raw
    # bn1 affine -> dense2
    w2f = w2 * g1.reshape(D1, 1)
    b2f = be1 @ w2 + b2
    # bn2 affine -> fused dense3·dense4
    w34 = (w3 * g2.reshape(D2, 1)) @ w4                    # (128, 57)
    b34 = be2 @ w3 @ w4 + b3 @ w4 + b4                     # (1, 57)
    w34p = jnp.zeros((D2, D_OUT_PAD), jnp.float32).at[:, :D_OUT].set(w34)
    b34p = jnp.zeros((1, D_OUT_PAD), jnp.float32).at[:, :D_OUT].set(b34)
    # int8 per-output-channel symmetric quantization of w1
    s1 = jnp.max(jnp.abs(w1), axis=0, keepdims=True) / 127.0      # (1, 512)
    s1 = jnp.maximum(s1, 1e-12)
    w1q = jnp.clip(jnp.round(w1 / s1), -127.0, 127.0).astype(jnp.int8)
    # packs
    wpack = jnp.concatenate([w2f, w34p], axis=0).astype(jnp.bfloat16)   # (640, 128)
    sb = jnp.concatenate([s1, b1, b2f, b34p], axis=1).astype(jnp.float32)  # (1, 1280)
    return (w1q, wpack, sb)


# ---------------------------------------------------------------------------
# References for validation.
# ---------------------------------------------------------------------------
def rh1_reference_f32(x, raw):
    """Intended module dataflow, full f32, unfused/unfolded/unquantized."""
    (w1, b1, g1, be1, w2, b2, g2, be2, w3, b3, w4, b4) = raw
    h = jnp.maximum(x @ w1 + b1, 0.0)
    m = h.mean(0, keepdims=True); v = ((h - m) ** 2).mean(0, keepdims=True)
    h = (h - m) / jnp.sqrt(v + EPS) * g1 + be1
    h = jnp.maximum(h @ w2 + b2, 0.0)
    m = h.mean(0, keepdims=True); v = ((h - m) ** 2).mean(0, keepdims=True)
    h = (h - m) / jnp.sqrt(v + EPS) * g2 + be2
    h = h @ w3 + b3
    return h @ w4 + b4


def rh1_reference_folded(x, folded):
    """Same math / dtypes as the kernel, in plain JAX (tight-tolerance check)."""
    w1q, wpack, sb = folded
    s1 = sb[:, :D1]
    b1 = sb[:, D1:2 * D1]
    b2 = sb[:, 2 * D1:2 * D1 + D2]
    b34 = sb[:, 2 * D1 + D2:]
    w1f = w1q.astype(jnp.float32).astype(jnp.bfloat16)
    h = jnp.dot(x.astype(jnp.bfloat16), w1f, preferred_element_type=jnp.float32) * s1 + b1
    h = jnp.maximum(h, 0.0)
    m = h.mean(0, keepdims=True)
    v = jnp.maximum((h * h).mean(0, keepdims=True) - m * m, 0.0)
    h = (h - m) * jax.lax.rsqrt(v + EPS)
    h = jnp.dot(h.astype(jnp.bfloat16), wpack[:D1].astype(jnp.bfloat16),
                preferred_element_type=jnp.float32) + b2
    h = jnp.maximum(h, 0.0)
    m = h.mean(0, keepdims=True)
    v = jnp.maximum((h * h).mean(0, keepdims=True) - m * m, 0.0)
    h = (h - m) * jax.lax.rsqrt(v + EPS)
    out = jnp.dot(h.astype(jnp.bfloat16), wpack[D1:].astype(jnp.bfloat16),
                  preferred_element_type=jnp.float32) + b34
    return out[:, :D_OUT]


if __name__ == "__main__":
    key = jax.random.PRNGKey(0)
    kx, kp = jax.random.split(key)
    B = 8
    x = jax.random.normal(kx, (B, D_IN), jnp.float32)

    raw = init_params(kp)
    folded = fold_params(raw)

    out = rh1_forward(x, folded)
    out = jax.block_until_ready(out)
    assert out.shape == (B, D_OUT), out.shape

    # Tight check against the dtype-matched (int8/bf16-folded) plain-JAX impl.
    ref_tight = rh1_reference_folded(x, folded)
    assert jnp.allclose(out, ref_tight, atol=2e-3, rtol=2e-3), "mismatch vs folded reference"

    # Loose check against the full-f32 unfused module semantics
    # (bounds the error from int8 w1 + bf16 weights + algebraic folding).
    ref_f32 = rh1_reference_f32(x, raw)
    assert jnp.allclose(out, ref_f32, atol=7.5e-2, rtol=5e-2), "mismatch vs f32 reference"

    print("KERNEL_OK")
</pallas_src>

<mosaic_0001>
module attributes {stable_mosaic.version = 11 : i64} {
  func.func @_rh1_kernel(%arg0: memref<8x1024xf32, #tpu.memory_space<vmem>>, %arg1: memref<1024x512xi8, #tpu.memory_space<vmem>>, %arg2: memref<640x128xbf16, #tpu.memory_space<vmem>>, %arg3: memref<1x1280xf32, #tpu.memory_space<vmem>>, %arg4: memref<8x128xf32, #tpu.memory_space<vmem>>) attributes {dimension_semantics = [], scalar_prefetch = 0 : i64, scratch_operands = 0 : i64, tpu.core_type = #tpu.core_type<tc>} {
    %c0 = arith.constant 0 : index
    %c0_0 = arith.constant 0 : index
    %0 = vector.load %arg3[%c0, %c0_0] : memref<1x1280xf32, #tpu.memory_space<vmem>>, vector<1x512xf32>
    %c0_1 = arith.constant 0 : index
    %c512 = arith.constant 512 : index
    %1 = vector.load %arg3[%c0_1, %c512] : memref<1x1280xf32, #tpu.memory_space<vmem>>, vector<1x512xf32>
    %c0_2 = arith.constant 0 : index
    %c1024 = arith.constant 1024 : index
    %2 = vector.load %arg3[%c0_2, %c1024] : memref<1x1280xf32, #tpu.memory_space<vmem>>, vector<1x128xf32>
    %c0_3 = arith.constant 0 : index
    %c1152 = arith.constant 1152 : index
    %3 = vector.load %arg3[%c0_3, %c1152] : memref<1x1280xf32, #tpu.memory_space<vmem>>, vector<1x128xf32>
    %c0_4 = arith.constant 0 : index
    %c0_5 = arith.constant 0 : index
    %4 = vector.load %arg1[%c0_4, %c0_5] : memref<1024x512xi8, #tpu.memory_space<vmem>>, vector<1024x512xi8>
    %5 = arith.sitofp %4 : vector<1024x512xi8> to vector<1024x512xf32>
    %6 = arith.truncf %5 : vector<1024x512xf32> to vector<1024x512xbf16>
    %c0_6 = arith.constant 0 : index
    %c0_7 = arith.constant 0 : index
    %7 = vector.load %arg0[%c0_6, %c0_7] : memref<8x1024xf32, #tpu.memory_space<vmem>>, vector<8x1024xf32>
    %8 = arith.truncf %7 : vector<8x1024xf32> to vector<8x1024xbf16>
    %cst = arith.constant dense<0.000000e+00> : vector<8x512xf32>
    %9 = tpu.matmul %8, %6, %cst {dimension_numbers = #tpu.dot_dimension_numbers<[1], [0], [0], [1], [0, 0, 1, 1], [], []>} : vector<8x1024xbf16>, vector<1024x512xbf16>, vector<8x512xf32> -> vector<8x512xf32>
    %10 = vector.broadcast %0 : vector<1x512xf32> to vector<8x512xf32>
    %11 = arith.mulf %9, %10 : vector<8x512xf32>
    %12 = vector.broadcast %1 : vector<1x512xf32> to vector<8x512xf32>
    %13 = arith.addf %11, %12 : vector<8x512xf32>
    %cst_8 = arith.constant 0.000000e+00 : f32
    %14 = vector.broadcast %cst_8 : f32 to vector<8x512xf32>
    %15 = arith.maximumf %13, %14 : vector<8x512xf32>
    %cst_9 = arith.constant dense<0.000000e+00> : vector<512xf32>
    %16 = vector.multi_reduction <add>, %15, %cst_9 [0] : vector<8x512xf32> to vector<512xf32>
    %17 = vector.shape_cast %16 : vector<512xf32> to vector<1x512xf32>
    %cst_10 = arith.constant 8.000000e+00 : f32
    %18 = vector.broadcast %cst_10 : f32 to vector<1x512xf32>
    %19 = arith.divf %17, %18 : vector<1x512xf32>
    %20 = arith.mulf %15, %15 : vector<8x512xf32>
    %cst_11 = arith.constant dense<0.000000e+00> : vector<512xf32>
    %21 = vector.multi_reduction <add>, %20, %cst_11 [0] : vector<8x512xf32> to vector<512xf32>
    %22 = vector.shape_cast %21 : vector<512xf32> to vector<1x512xf32>
    %cst_12 = arith.constant 8.000000e+00 : f32
    %23 = vector.broadcast %cst_12 : f32 to vector<1x512xf32>
    %24 = arith.divf %22, %23 : vector<1x512xf32>
    %25 = arith.mulf %19, %19 : vector<1x512xf32>
    %26 = arith.subf %24, %25 : vector<1x512xf32>
    %cst_13 = arith.constant 0.000000e+00 : f32
    %27 = vector.broadcast %cst_13 : f32 to vector<1x512xf32>
    %28 = arith.maximumf %26, %27 : vector<1x512xf32>
    %29 = vector.broadcast %19 : vector<1x512xf32> to vector<8x512xf32>
    %30 = arith.subf %15, %29 : vector<8x512xf32>
    %cst_14 = arith.constant 9.99999974E-6 : f32
    %31 = vector.broadcast %cst_14 : f32 to vector<1x512xf32>
    %32 = arith.addf %28, %31 : vector<1x512xf32>
    %33 = math.rsqrt %32 : vector<1x512xf32>
    %34 = vector.broadcast %33 : vector<1x512xf32> to vector<8x512xf32>
    %35 = arith.mulf %30, %34 : vector<8x512xf32>
    %36 = arith.truncf %35 : vector<8x512xf32> to vector<8x512xbf16>
    %c0_15 = arith.constant 0 : index
    %c0_16 = arith.constant 0 : index
    %37 = vector.load %arg2[%c0_15, %c0_16] : memref<640x128xbf16, #tpu.memory_space<vmem>>, vector<512x128xbf16>
    %cst_17 = arith.constant dense<0.000000e+00> : vector<8x128xf32>
    %38 = tpu.matmul %36, %37, %cst_17 {dimension_numbers = #tpu.dot_dimension_numbers<[1], [0], [0], [1], [0, 0, 1, 1], [], []>} : vector<8x512xbf16>, vector<512x128xbf16>, vector<8x128xf32> -> vector<8x128xf32>
    %39 = vector.broadcast %2 : vector<1x128xf32> to vector<8x128xf32>
    %40 = arith.addf %38, %39 : vector<8x128xf32>
    %cst_18 = arith.constant 0.000000e+00 : f32
    %41 = vector.broadcast %cst_18 : f32 to vector<8x128xf32>
    %42 = arith.maximumf %40, %41 : vector<8x128xf32>
    %cst_19 = arith.constant dense<0.000000e+00> : vector<128xf32>
    %43 = vector.multi_reduction <add>, %42, %cst_19 [0] : vector<8x128xf32> to vector<128xf32>
    %44 = vector.shape_cast %43 : vector<128xf32> to vector<1x128xf32>
    %cst_20 = arith.constant 8.000000e+00 : f32
    %45 = vector.broadcast %cst_20 : f32 to vector<1x128xf32>
    %46 = arith.divf %44, %45 : vector<1x128xf32>
    %47 = arith.mulf %42, %42 : vector<8x128xf32>
    %cst_21 = arith.constant dense<0.000000e+00> : vector<128xf32>
    %48 = vector.multi_reduction <add>, %47, %cst_21 [0] : vector<8x128xf32> to vector<128xf32>
    %49 = vector.shape_cast %48 : vector<128xf32> to vector<1x128xf32>
    %cst_22 = arith.constant 8.000000e+00 : f32
    %50 = vector.broadcast %cst_22 : f32 to vector<1x128xf32>
    %51 = arith.divf %49, %50 : vector<1x128xf32>
    %52 = arith.mulf %46, %46 : vector<1x128xf32>
    %53 = arith.subf %51, %52 : vector<1x128xf32>
    %cst_23 = arith.constant 0.000000e+00 : f32
    %54 = vector.broadcast %cst_23 : f32 to vector<1x128xf32>
    %55 = arith.maximumf %53, %54 : vector<1x128xf32>
    %56 = vector.broadcast %46 : vector<1x128xf32> to vector<8x128xf32>
    %57 = arith.subf %42, %56 : vector<8x128xf32>
    %cst_24 = arith.constant 9.99999974E-6 : f32
    %58 = vector.broadcast %cst_24 : f32 to vector<1x128xf32>
    %59 = arith.addf %55, %58 : vector<1x128xf32>
    %60 = math.rsqrt %59 : vector<1x128xf32>
    %61 = vector.broadcast %60 : vector<1x128xf32> to vector<8x128xf32>
    %62 = arith.mulf %57, %61 : vector<8x128xf32>
    %63 = arith.truncf %62 : vector<8x128xf32> to vector<8x128xbf16>
    %c512_25 = arith.constant 512 : index
    %c0_26 = arith.constant 0 : index
    %64 = vector.load %arg2[%c512_25, %c0_26] : memref<640x128xbf16, #tpu.memory_space<vmem>>, vector<128x128xbf16>
    %cst_27 = arith.constant dense<0.000000e+00> : vector<8x128xf32>
    %65 = tpu.matmul %63, %64, %cst_27 {dimension_numbers = #tpu.dot_dimension_numbers<[1], [0], [0], [1], [0, 0, 1, 1], [], []>} : vector<8x128xbf16>, vector<128x128xbf16>, vector<8x128xf32> -> vector<8x128xf32>
    %66 = vector.broadcast %3 : vector<1x128xf32> to vector<8x128xf32>
    %67 = arith.addf %65, %66 : vector<8x128xf32>
    %c0_28 = arith.constant 0 : index
    %c0_29 = arith.constant 0 : index
    %68 = vector.load %arg4[%c0_28, %c0_29] : memref<8x128xf32, #tpu.memory_space<vmem>>, vector<8x128xf32>
    tpu.vector_store %arg4[%c0_28, %c0_29], %67 {strides = array<i32>} : memref<8x128xf32, #tpu.memory_space<vmem>>, vector<8x128xf32>,
    return
  }
}

</mosaic_0001>

<bundles_post_ra>
// kernel: tpu_custom_call.1
= control target key start
LH: loop header
LB: loop body
LE: loop exit
PB: predicated region body
PF: predicated region fallthrough
CT: control target
= control target key end

     0   :  { %9 = vsyncpa [#allocation3], 0  ;;  %s1846_s0 = inlined_call_operand.hbm [shape: f32[8,1024], index: 0, kind: input, shape index: {}]   ;;  %s1847_s1 = inlined_call_operand.hbm [shape: s8[1024,512], index: 1, kind: input, shape index: {}]   ;;  %s1848_s2 = inlined_call_operand.hbm [shape: bf16[640,128], index: 2, kind: input, shape index: {}]   ;;  %s1849_s3 = inlined_call_operand.vmem [shape: f32[1,1280], index: 3, kind: input, shape index: {}]   ;;  %s1850_s4 = inlined_call_operand.hbm [shape: f32[8,128], index: 4, kind: output, shape index: {}]  }
   0x1   :  { %10 = vsyncpa [#allocation6], 0 }
   0x2   :  { %11 = vsyncpa [#allocation4], 0  ;;  %s1723_s15 = smov [#allocation5]   ;;  %s1629_s19 = scalar_lea.hbm %s1847_s1, 16384 }
   0x3   :  { %s27_s16 = sshll.u32 %s1723_s15, 4  ;;  %p1630_p0 = scmp.ne.s32.totalorder %s1847_s1, %s1629_s19  ;;  %s28_s16 = int_to_ptr.vmem [resolvable:$true] %s27_s16 }
   0x4   :  { %p1633_p1 = scmp.lt.u32.totalorder %s1629_s19, %s1847_s1 }
   0x6   :  { %p1635_p2 = pnand %p1633_p1, %p1630_p0 }
   0x8   :  { %1638 = shalt.err (!%p1635_p2)
}
   0x9   :  { %s1639_s24 = scalar_lea.vmem %s28_s16, 16384  ;;  %p1644_p4 = scmp.lt.s32.totalorder %s28_s16, %s28_s16 }
   0xa   :  { %p1640_p3 = scmp.ne.s32.totalorder %s28_s16, %s1639_s24  ;;  %p1645_p5 = scmp.lt.s32.totalorder %s1639_s24, %s1639_s24 }
   0xc   :  { %p1646_p6 = por %p1645_p5, %p1644_p4 }
   0xe   :  { %p1647_p7 = pnand %p1646_p6, %p1640_p3 }
  0x10   :  { %1650 = shalt.err (!%p1647_p7)
}
  0x11   :  { %s1724_s25 = smov 512   ;;  %s1725_s26 = smov 32  }
  0x12   :  { %33 = dma.hbm_to_vmem [thread:$0]  %s1847_s1, 16384, %s28_s16, [#allocation6], %s1724_s25, %s1724_s25, %s1725_s26  }
  0x13   :  { %s1726_s29 = smov [#allocation2]   ;;  %s1727_s5 = smov [#allocation7]  }
  0x14   :  { %s18_s30 = sshll.u32 %s1726_s29, 4  ;;  %s39_s6 = sshll.u32 %s1727_s5, 4  ;;  %s19_s30 = int_to_ptr.vmem [resolvable:$true] %s18_s30  ;;  %s40_s6 = int_to_ptr.vmem [resolvable:$true] %s39_s6 }
  0x15   :  { %s1651_s9 = scalar_lea.hbm %s1846_s0, 1024 }
  0x16   :  { %p1652_p8 = scmp.ne.s32.totalorder %s1846_s0, %s1651_s9  ;;  %p1655_p9 = scmp.lt.u32.totalorder %s1651_s9, %s1846_s0 }
  0x18   :  { %p1657_p10 = pnand %p1655_p9, %p1652_p8 }
  0x1a   :  { %1660 = shalt.err (!%p1657_p10)
}
  0x1b   :  { %s1661_s1 = scalar_lea.vmem %s19_s30, 1024  ;;  %p1666_p12 = scmp.lt.s32.totalorder %s19_s30, %s19_s30 }
  0x1c   :  { %p1662_p11 = scmp.ne.s32.totalorder %s19_s30, %s1661_s1  ;;  %p1667_p13 = scmp.lt.s32.totalorder %s1661_s1, %s1661_s1 }
  0x1e   :  { %p1668_p0 = por %p1667_p13, %p1666_p12 }
  0x20   :  { %p1669_p1 = pnand %p1668_p0, %p1662_p11 }
  0x22   :  { %1672 = shalt.err (!%p1669_p1)
}
  0x23   :  { %21 = dma.hbm_to_vmem [thread:$0]  %s1846_s0, 1024, %s19_s30, [#allocation3]  }
  0x24   :  { %s1673_s18 = scalar_lea.hbm %s1848_s2, 5120 }
  0x25   :  { %p1674_p2 = scmp.ne.s32.totalorder %s1848_s2, %s1673_s18  ;;  %p1677_p3 = scmp.lt.u32.totalorder %s1673_s18, %s1848_s2 }
  0x27   :  { %p1679_p4 = pnand %p1677_p3, %p1674_p2 }
  0x29   :  { %1682 = shalt.err (!%p1679_p4)
}
  0x2a   :  { %s1683_s23 = scalar_lea.vmem %s40_s6, 5120  ;;  %p1688_p6 = scmp.lt.s32.totalorder %s40_s6, %s40_s6 }
  0x2b   :  { %p1684_p5 = scmp.ne.s32.totalorder %s40_s6, %s1683_s23  ;;  %p1689_p7 = scmp.lt.s32.totalorder %s1683_s23, %s1683_s23 }
  0x2d   :  { %p1690_p8 = por %p1689_p7, %p1688_p6 }
  0x2f   :  { %p1691_p9 = pnand %p1690_p8, %p1684_p5 }
  0x31   :  { %1694 = shalt.err (!%p1691_p9)
}
  0x32   :  { %s1728_s0 = smov 64   ;;  %s1729_s24 = smov 4  }
  0x33   :  { %45 = dma.hbm_to_vmem [thread:$0]  %s1848_s2, 5120, %s40_s6, [#allocation6], %s1728_s0, %s1728_s0, %s1729_s24  }
  0x34   :  { %1717 = dma.done.wait [#allocation3], 1024  }
  0x35   :  { %1718 = vsyncadd [#allocation3], 4294966272 }
  0x36   :  { %1719 = dma.done.wait [#allocation6], 21504  }
  0x37   :  { %1720 = vsyncadd [#allocation6], 4294945792  ;;  %v63_v0 = vld [vmem:[#allocation5 + $0x8] sm:$0xff]  ;;  %v65_v1 = vld [vmem:[#allocation5 + $0x18] sm:$0xff]  ;;  %vm1731_vm0 = vmmov 0   ;;  %s1732_s8 = smov [#allocation8]  }
  0x38   :  { %v62_v2 = vld [vmem:[#allocation5] sm:$0xff]  ;;  %v191_v3 = vunpack.c.l.s8.bf16 %v63_v0  ;;  %v195_v4 = vunpack.c.h.s8.bf16 %v63_v0  ;;  %v193_v5 = vunpack.c.l.s8.bf16 %v65_v1  ;;  %v197_v6 = vunpack.c.h.s8.bf16 %v65_v1  ;;  %v64_v7 = vld [vmem:[#allocation5 + $0x10] sm:$0xff]  ;;  %v67_v10 = vld [vmem:[#allocation5 + $0x28] sm:$0xff]  ;;  %s1420_s9 = sshll.u32 %s1732_s8, 4  ;;  %s1421_s9 = int_to_ptr.vmem [resolvable:$true] %s1420_s9 }
  0x39   :  { %v190_v8 = vunpack.c.l.s8.bf16 %v62_v2  ;;  %v192_v9 = vunpack.c.l.s8.bf16 %v64_v7  ;;  %v69_v11 = vld [vmem:[#allocation5 + $0x38] sm:$0xff]  ;;  %v194_v12 = vunpack.c.h.s8.bf16 %v62_v2  ;;  %v196_v13 = vunpack.c.h.s8.bf16 %v64_v7  ;;  %v66_v16 = vld [vmem:[#allocation5 + $0x20] sm:$0xff]  ;;  %v68_v17 = vld [vmem:[#allocation5 + $0x30] sm:$0xff]  ;;  %s1695_s10 = scalar_lea.vmem %s1421_s9, 128  ;;  %p1700_p11 = scmp.lt.s32.totalorder %s1421_s9, %s1421_s9 }
  0x3a   :  { %462 = vmatprep.subr.bf16.mxu0 %v191_v3  ;;  %626 = vmatprep.subr.bf16.mxu1 %v193_v5  ;;  %v199_v14 = vunpack.c.l.s8.bf16 %v67_v10  ;;  %v201_v15 = vunpack.c.l.s8.bf16 %v69_v11  ;;  %v198_v18 = vunpack.c.l.s8.bf16 %v66_v16  ;;  %v200_v19 = vunpack.c.l.s8.bf16 %v68_v17  ;;  %v71_v22 = vld [vmem:[#allocation5 + $0x48] sm:$0xff]  ;;  %v73_v23 = vld [vmem:[#allocation5 + $0x58] sm:$0xff]  ;;  %v70_v28 = vld [vmem:[#allocation5 + $0x40] sm:$0xff]  ;;  %p1696_p10 = scmp.ne.s32.totalorder %s1421_s9, %s1695_s10  ;;  %p1701_p12 = scmp.lt.s32.totalorder %s1695_s10, %s1695_s10 }
  0x3b   :  { %463 = vmatpush1.bf16.msra.mxu0 %v190_v8  ;;  %627 = vmatpush1.bf16.msra.mxu1 %v192_v9  ;;  %v203_v20 = vunpack.c.h.s8.bf16 %v67_v10  ;;  %v205_v21 = vunpack.c.h.s8.bf16 %v69_v11  ;;  %v202_v24 = vunpack.c.h.s8.bf16 %v66_v16  ;;  %v204_v25 = vunpack.c.h.s8.bf16 %v68_v17  ;;  %v72_v29 = vld [vmem:[#allocation5 + $0x50] sm:$0xff]  ;;  %v447_v30 = vld [vmem:[#allocation2 + $0x8] sm:$0xff]  ;;  %v77_v37 = vld [vmem:[#allocation5 + $0x78] sm:$0xff] }
  0x3c   :  { %464 = vmatprep.subr.bf16.mxu0 %v195_v4  ;;  %628 = vmatprep.subr.bf16.mxu1 %v197_v6  ;;  %v207_v26 = vunpack.c.l.s8.bf16 %v71_v22  ;;  %v209_v27 = vunpack.c.l.s8.bf16 %v73_v23  ;;  %v206_v31 = vunpack.c.l.s8.bf16 %v70_v28  ;;  %v208_v32 = vunpack.c.l.s8.bf16 %v72_v29  ;;  %v75_v36 = vld [vmem:[#allocation5 + $0x68] sm:$0xff]  ;;  %v74_v42 = vld [vmem:[#allocation5 + $0x60] sm:$0xff]  ;;  %v76_v43 = vld [vmem:[#allocation5 + $0x70] sm:$0xff]  ;;  %p1702_p13 = por %p1701_p12, %p1700_p11 }
  0x3d   :  { %v211_v33 = vunpack.c.h.s8.bf16 %v71_v22  ;;  %v213_v34 = vunpack.c.h.s8.bf16 %v73_v23  ;;  %v455_v35 = vpack.c.bf16 %v447_v30, %v447_v30  ;;  %v210_v38 = vunpack.c.h.s8.bf16 %v70_v28  ;;  %v79_v48 = vld [vmem:[#allocation5 + $0x88] sm:$0xff]  ;;  %v81_v49 = vld [vmem:[#allocation5 + $0x98] sm:$0xff]  ;;  %v78_v50 = vld [vmem:[#allocation5 + $0x80] sm:$0xff] }
  0x3e   :  { %v212_v39 = vunpack.c.h.s8.bf16 %v72_v29  ;;  %v215_v40 = vunpack.c.l.s8.bf16 %v75_v36  ;;  %v217_v41 = vunpack.c.l.s8.bf16 %v77_v37  ;;  %v214_v44 = vunpack.c.l.s8.bf16 %v74_v42  ;;  %v80_v51 = vld [vmem:[#allocation5 + $0x90] sm:$0xff]  ;;  %v83_v60 = vld [vmem:[#allocation5 + $0xa8] sm:$0xff]  ;;  %v85_v61 = vld [vmem:[#allocation5 + $0xb8] sm:$0xff]  ;;  %p1703_p0 = pnand %p1702_p13, %p1696_p10 }
  0x3f   :  { %465 = vmatpush1.bf16.msra.mxu0 %v194_v12  ;;  %629 = vmatpush1.bf16.msra.mxu1 %v196_v13  ;;  %v216_v45 = vunpack.c.l.s8.bf16 %v76_v43  ;;  %v219_v46 = vunpack.c.h.s8.bf16 %v75_v36  ;;  %v221_v47 = vunpack.c.h.s8.bf16 %v77_v37  ;;  %v218_v52 = vunpack.c.h.s8.bf16 %v74_v42  ;;  %v82_v62 = vld [vmem:[#allocation5 + $0xa0] sm:$0xff]  ;;  %v84_v63 = vld [vmem:[#allocation5 + $0xb0] sm:$0xff]  ;;  %v87_v8 = vld [vmem:[#allocation5 + $0xc8] sm:$0xff] }
  0x40   :  { %466 = vmatprep.subr.bf16.mxu0 %v199_v14  ;;  %630 = vmatprep.subr.bf16.mxu1 %v201_v15  ;;  %v220_v53 = vunpack.c.h.s8.bf16 %v76_v43  ;;  %v223_v54 = vunpack.c.l.s8.bf16 %v79_v48  ;;  %v225_v55 = vunpack.c.l.s8.bf16 %v81_v49  ;;  %v222_v56 = vunpack.c.l.s8.bf16 %v78_v50  ;;  %v89_v9 = vld [vmem:[#allocation5 + $0xd8] sm:$0xff]  ;;  %v86_v10 = vld [vmem:[#allocation5 + $0xc0] sm:$0xff]  ;;  %v88_v11 = vld [vmem:[#allocation5 + $0xd0] sm:$0xff] }
  0x41   :  { %494 = vmatprep.mubr.bf16.mxu0 %v455_v35  ;;  %658 = vmatprep.mubr.bf16.mxu1 %v455_v35  ;;  %v224_v57 = vunpack.c.l.s8.bf16 %v80_v51  ;;  %v227_v58 = vunpack.c.h.s8.bf16 %v79_v48  ;;  %v229_v59 = vunpack.c.h.s8.bf16 %v81_v49  ;;  %v226_v0 = vunpack.c.h.s8.bf16 %v78_v50  ;;  %v90_v22 = vld [vmem:[#allocation5 + $0xe0] sm:$0xff]  ;;  %v92_v23 = vld [vmem:[#allocation5 + $0xf0] sm:$0xff]  ;;  %v449_v42 = vld [vmem:[#allocation2 + $0x18] sm:$0xff] }
  0x42   :  { %v228_v1 = vunpack.c.h.s8.bf16 %v80_v51  ;;  %v231_v2 = vunpack.c.l.s8.bf16 %v83_v60  ;;  %v233_v3 = vunpack.c.l.s8.bf16 %v85_v61  ;;  %v230_v4 = vunpack.c.l.s8.bf16 %v82_v62  ;;  %v446_v36 = vld [vmem:[#allocation2] sm:$0xff]  ;;  %v101_v48 = vld [vmem:[#allocation5 + $0x138] sm:$0xff] }
  0x43   :  { %467 = vmatpush1.bf16.msra.mxu0 %v198_v18  ;;  %631 = vmatpush1.bf16.msra.mxu1 %v200_v19  ;;  %v232_v5 = vunpack.c.l.s8.bf16 %v84_v63  ;;  %v235_v6 = vunpack.c.h.s8.bf16 %v83_v60  ;;  %v237_v7 = vunpack.c.h.s8.bf16 %v85_v61  ;;  %v234_v12 = vunpack.c.h.s8.bf16 %v82_v62  ;;  %v103_v60 = vld [vmem:[#allocation5 + $0x148] sm:$0xff]  ;;  %v105_v61 = vld [vmem:[#allocation5 + $0x158] sm:$0xff] }
  0x44   :  { %468 = vmatprep.subr.bf16.mxu0 %v203_v20  ;;  %632 = vmatprep.subr.bf16.mxu1 %v205_v21  ;;  %v236_v13 = vunpack.c.h.s8.bf16 %v84_v63  ;;  %v239_v14 = vunpack.c.l.s8.bf16 %v87_v8  ;;  %v241_v15 = vunpack.c.l.s8.bf16 %v89_v9  ;;  %v238_v16 = vunpack.c.l.s8.bf16 %v86_v10  ;;  %v91_v20 = vld [vmem:[#allocation5 + $0xe8] sm:$0xff]  ;;  %v93_v21 = vld [vmem:[#allocation5 + $0xf8] sm:$0xff] }
  0x45   :  { %v240_v17 = vunpack.c.l.s8.bf16 %v88_v11  ;;  %v243_v18 = vunpack.c.h.s8.bf16 %v87_v8  ;;  %v245_v19 = vunpack.c.h.s8.bf16 %v89_v9  ;;  %v246_v28 = vunpack.c.l.s8.bf16 %v90_v22  ;;  %v107_v8 = vld [vmem:[#allocation5 + $0x168] sm:$0xff]  ;;  %v109_v9 = vld [vmem:[#allocation5 + $0x178] sm:$0xff] }
  0x46   :  { %v248_v29 = vunpack.c.l.s8.bf16 %v92_v23  ;;  %v251_v30 = vunpack.c.h.s8.bf16 %v91_v20  ;;  %v252_v35 = vunpack.c.h.s8.bf16 %v92_v23  ;;  %v457_v49 = vpack.c.bf16 %v449_v42, %v449_v42 }
  0x47   :  { %469 = vmatpush1.bf16.msra.mxu0 %v202_v24  ;;  %633 = vmatpush1.bf16.msra.mxu1 %v204_v25  ;;  %v242_v24 = vunpack.c.h.s8.bf16 %v86_v10  ;;  %v244_v25 = vunpack.c.h.s8.bf16 %v88_v11 }
  0x48   :  { %470 = vmatprep.subr.bf16.mxu0 %v207_v26  ;;  %634 = vmatprep.subr.bf16.mxu1 %v209_v27  ;;  %v247_v26 = vunpack.c.l.s8.bf16 %v91_v20  ;;  %v249_v27 = vunpack.c.l.s8.bf16 %v93_v21  ;;  %v111_v20 = vld [vmem:[#allocation5 + $0x188] sm:$0xff] }
  0x4b   :  { %471 = vmatpush1.bf16.msra.mxu0 %v206_v31  ;;  %635 = vmatpush1.bf16.msra.mxu1 %v208_v32  ;;  %v253_v31 = vunpack.c.h.s8.bf16 %v93_v21  ;;  %v95_v32 = vld [vmem:[#allocation5 + $0x108] sm:$0xff]  ;;  %v113_v21 = vld [vmem:[#allocation5 + $0x198] sm:$0xff] }
  0x4c   :  { %472 = vmatprep.subr.bf16.mxu0 %v211_v33  ;;  %636 = vmatprep.subr.bf16.mxu1 %v213_v34  ;;  %v97_v33 = vld [vmem:[#allocation5 + $0x118] sm:$0xff]  ;;  %v250_v34 = vunpack.c.h.s8.bf16 %v90_v22  ;;  %v255_v37 = vunpack.c.l.s8.bf16 %v95_v32 }
  0x4f   :  { %473 = vmatpush1.bf16.msra.mxu0 %v210_v38  ;;  %637 = vmatpush1.bf16.msra.mxu1 %v212_v39  ;;  %v257_v38 = vunpack.c.l.s8.bf16 %v97_v33  ;;  %v94_v39 = vld [vmem:[#allocation5 + $0x100] sm:$0xff] }
  0x50   :  { %474 = vmatprep.subr.bf16.mxu0 %v215_v40  ;;  %638 = vmatprep.subr.bf16.mxu1 %v217_v41  ;;  %v96_v40 = vld [vmem:[#allocation5 + $0x110] sm:$0xff]  ;;  %v454_v41 = vpack.c.bf16 %v446_v36, %v446_v36  ;;  %v254_v43 = vunpack.c.l.s8.bf16 %v94_v39  ;;  %v258_v50 = vunpack.c.h.s8.bf16 %v94_v39 }
  0x51   :  { %v260_v51 = vunpack.c.h.s8.bf16 %v96_v40  ;;  %v116_v39 = vld [vmem:[#allocation5 + $0x1b0] sm:$0xff] }
  0x53   :  { %475 = vmatpush1.bf16.msra.mxu0 %v214_v44  ;;  %639 = vmatpush1.bf16.msra.mxu1 %v216_v45  ;;  %v256_v44 = vunpack.c.l.s8.bf16 %v96_v40  ;;  %v259_v45 = vunpack.c.h.s8.bf16 %v95_v32  ;;  %v115_v32 = vld [vmem:[#allocation5 + $0x1a8] sm:$0xff] }
  0x54   :  { %476 = vmatprep.subr.bf16.mxu0 %v219_v46  ;;  %640 = vmatprep.subr.bf16.mxu1 %v221_v47  ;;  %v261_v46 = vunpack.c.h.s8.bf16 %v97_v33  ;;  %v99_v47 = vld [vmem:[#allocation5 + $0x128] sm:$0xff]  ;;  %v117_v33 = vld [vmem:[#allocation5 + $0x1b8] sm:$0xff]  ;;  %v295_v36 = vunpack.c.l.s8.bf16 %v115_v32  ;;  %v299_v42 = vunpack.c.h.s8.bf16 %v115_v32 }
  0x55   :  { %v135_v32 = vld [vmem:[#allocation5 + $0x248] sm:$0xff] }
  0x57   :  { %477 = vmatpush1.bf16.msra.mxu0 %v218_v52  ;;  %641 = vmatpush1.bf16.msra.mxu1 %v220_v53  ;;  %v263_v52 = vunpack.c.l.s8.bf16 %v99_v47  ;;  %v265_v53 = vunpack.c.l.s8.bf16 %v101_v48 }
  0x58   :  { %478 = vmatprep.subr.bf16.mxu0 %v223_v54  ;;  %642 = vmatprep.subr.bf16.mxu1 %v225_v55  ;;  %v98_v54 = vld [vmem:[#allocation5 + $0x120] sm:$0xff]  ;;  %v100_v55 = vld [vmem:[#allocation5 + $0x130] sm:$0xff] }
  0x59   :  { %v266_v62 = vunpack.c.h.s8.bf16 %v98_v54  ;;  %v268_v63 = vunpack.c.h.s8.bf16 %v100_v55 }
  0x5b   :  { %479 = vmatpush1.bf16.msra.mxu0 %v222_v56  ;;  %643 = vmatpush1.bf16.msra.mxu1 %v224_v57  ;;  %v262_v56 = vunpack.c.l.s8.bf16 %v98_v54  ;;  %v264_v57 = vunpack.c.l.s8.bf16 %v100_v55 }
  0x5c   :  { %480 = vmatprep.subr.bf16.mxu0 %v227_v58  ;;  %644 = vmatprep.subr.bf16.mxu1 %v229_v59  ;;  %v267_v58 = vunpack.c.h.s8.bf16 %v99_v47  ;;  %v269_v59 = vunpack.c.h.s8.bf16 %v101_v48  ;;  %v300_v47 = vunpack.c.h.s8.bf16 %v116_v39 }
  0x5f   :  { %481 = vmatpush1.bf16.msra.mxu0 %v226_v0  ;;  %645 = vmatpush1.bf16.msra.mxu1 %v228_v1  ;;  %v271_v0 = vunpack.c.l.s8.bf16 %v103_v60  ;;  %v273_v1 = vunpack.c.l.s8.bf16 %v105_v61 }
  0x60   :  { %482 = vmatprep.subr.bf16.mxu0 %v231_v2  ;;  %646 = vmatprep.subr.bf16.mxu1 %v233_v3  ;;  %v102_v2 = vld [vmem:[#allocation5 + $0x140] sm:$0xff]  ;;  %v104_v3 = vld [vmem:[#allocation5 + $0x150] sm:$0xff] }
  0x61   :  { %v274_v10 = vunpack.c.h.s8.bf16 %v102_v2  ;;  %v276_v11 = vunpack.c.h.s8.bf16 %v104_v3 }
  0x63   :  { %483 = vmatpush1.bf16.msra.mxu0 %v230_v4  ;;  %647 = vmatpush1.bf16.msra.mxu1 %v232_v5  ;;  %v270_v4 = vunpack.c.l.s8.bf16 %v102_v2  ;;  %v272_v5 = vunpack.c.l.s8.bf16 %v104_v3 }
  0x64   :  { %484 = vmatprep.subr.bf16.mxu0 %v235_v6  ;;  %648 = vmatprep.subr.bf16.mxu1 %v237_v7  ;;  %v275_v6 = vunpack.c.h.s8.bf16 %v103_v60  ;;  %v277_v7 = vunpack.c.h.s8.bf16 %v105_v61 }
  0x67   :  { %485 = vmatpush1.bf16.msra.mxu0 %v234_v12  ;;  %649 = vmatpush1.bf16.msra.mxu1 %v236_v13  ;;  %v279_v12 = vunpack.c.l.s8.bf16 %v107_v8  ;;  %v281_v13 = vunpack.c.l.s8.bf16 %v109_v9 }
  0x68   :  { %486 = vmatprep.subr.bf16.mxu0 %v239_v14  ;;  %650 = vmatprep.subr.bf16.mxu1 %v241_v15  ;;  %v106_v14 = vld [vmem:[#allocation5 + $0x160] sm:$0xff]  ;;  %v108_v15 = vld [vmem:[#allocation5 + $0x170] sm:$0xff] }
  0x69   :  { %v282_v22 = vunpack.c.h.s8.bf16 %v106_v14  ;;  %v284_v23 = vunpack.c.h.s8.bf16 %v108_v15 }
  0x6b   :  { %487 = vmatpush1.bf16.msra.mxu0 %v238_v16  ;;  %651 = vmatpush1.bf16.msra.mxu1 %v240_v17  ;;  %v278_v16 = vunpack.c.l.s8.bf16 %v106_v14  ;;  %v280_v17 = vunpack.c.l.s8.bf16 %v108_v15  ;;  %v451_v14 = vld [vmem:[#allocation2 + $0x28] sm:$0xff] }
  0x6c   :  { %488 = vmatprep.subr.bf16.mxu0 %v243_v18  ;;  %652 = vmatprep.subr.bf16.mxu1 %v245_v19  ;;  %v283_v18 = vunpack.c.h.s8.bf16 %v107_v8  ;;  %v285_v19 = vunpack.c.h.s8.bf16 %v109_v9  ;;  %v448_v8 = vld [vmem:[#allocation2 + $0x10] sm:$0xff] }
  0x6f   :  { %489 = vmatpush1.bf16.msra.mxu0 %v242_v24  ;;  %653 = vmatpush1.bf16.msra.mxu1 %v244_v25  ;;  %v287_v24 = vunpack.c.l.s8.bf16 %v111_v20  ;;  %v289_v25 = vunpack.c.l.s8.bf16 %v113_v21 }
  0x70   :  { %490 = vmatprep.subr.bf16.mxu0 %v247_v26  ;;  %654 = vmatprep.subr.bf16.mxu1 %v249_v27  ;;  %v110_v26 = vld [vmem:[#allocation5 + $0x180] sm:$0xff]  ;;  %v112_v27 = vld [vmem:[#allocation5 + $0x190] sm:$0xff] }
  0x73   :  { %491 = vmatpush1.bf16.msra.mxu0 %v246_v28  ;;  %655 = vmatpush1.bf16.msra.mxu1 %v248_v29  ;;  %v286_v28 = vunpack.c.l.s8.bf16 %v110_v26  ;;  %v288_v29 = vunpack.c.l.s8.bf16 %v112_v27 }
  0x74   :  { %492 = vmatprep.subr.bf16.mxu0 %v251_v30  ;;  %656 = vmatprep.subr.bf16.mxu1 %v253_v31  ;;  %v291_v30 = vunpack.c.h.s8.bf16 %v111_v20  ;;  %v293_v31 = vunpack.c.h.s8.bf16 %v113_v21  ;;  %v133_v20 = vld [vmem:[#allocation5 + $0x238] sm:$0xff]  ;;  %v459_v21 = vpack.c.bf16 %v451_v14, %v451_v14 }
  0x77   :  { %493 = vmatpush1.bf16.msra.mxu0 %v250_v34  ;;  %657 = vmatpush1.bf16.msra.mxu1 %v252_v35  ;;  %v290_v34 = vunpack.c.h.s8.bf16 %v110_v26  ;;  %v292_v35 = vunpack.c.h.s8.bf16 %v112_v27  ;;  %v130_v26 = vld [vmem:[#allocation5 + $0x220] sm:$0xff]  ;;  %v132_v27 = vld [vmem:[#allocation5 + $0x230] sm:$0xff] }
  0x78   :  { %503 = vmatprep.subr.bf16.mxu0 %v255_v37  ;;  %667 = vmatprep.subr.bf16.mxu1 %v257_v38  ;;  %v297_v37 = vunpack.c.l.s8.bf16 %v117_v33  ;;  %v114_v38 = vld [vmem:[#allocation5 + $0x1a0] sm:$0xff] }
  0x79   :  { %v294_v40 = vunpack.c.l.s8.bf16 %v114_v38 }
  0x7a   :  { %495 = vmatmul.mubr.bf16.vlgmr.msra.gmra.mrb[0].mxu0 %v454_v41  ;;  %659 = vmatmul.mubr.bf16.vlgmr.msra.gmra.mrb[0].mxu1 %v454_v41  ;;  %v296_v41 = vunpack.c.l.s8.bf16 %v116_v39  ;;  %v136_v39 = vld [vmem:[#allocation5 + $0x250] sm:$0xff] }
  0x7b   :  { %504 = vmatpush1.bf16.msra.mxu0 %v254_v43  ;;  %668 = vmatpush1.bf16.msra.mxu1 %v256_v44  ;;  %v301_v43 = vunpack.c.h.s8.bf16 %v117_v33  ;;  %v119_v44 = vld [vmem:[#allocation5 + $0x1c8] sm:$0xff]  ;;  %v137_v33 = vld [vmem:[#allocation5 + $0x258] sm:$0xff] }
  0x7c   :  { %505 = vmatprep.subr.bf16.mxu0 %v259_v45  ;;  %669 = vmatprep.subr.bf16.mxu1 %v261_v46  ;;  %v121_v45 = vld [vmem:[#allocation5 + $0x1d8] sm:$0xff]  ;;  %v298_v46 = vunpack.c.h.s8.bf16 %v114_v38  ;;  %v303_v48 = vunpack.c.l.s8.bf16 %v119_v44  ;;  %v307_v54 = vunpack.c.h.s8.bf16 %v119_v44  ;;  %v134_v38 = vld [vmem:[#allocation5 + $0x240] sm:$0xff]  ;;  %v139_v44 = vld [vmem:[#allocation5 + $0x268] sm:$0xff] }
  0x7d   :  { %535 = vmatprep.mubr.bf16.mxu0 %v457_v49  ;;  %699 = vmatprep.mubr.bf16.mxu1 %v457_v49  ;;  %v305_v49 = vunpack.c.l.s8.bf16 %v121_v45  ;;  %v309_v55 = vunpack.c.h.s8.bf16 %v121_v45  ;;  %v141_v45 = vld [vmem:[#allocation5 + $0x278] sm:$0xff] }
  0x7f   :  { %506 = vmatpush1.bf16.msra.mxu0 %v258_v50  ;;  %670 = vmatpush1.bf16.msra.mxu1 %v260_v51  ;;  %v118_v50 = vld [vmem:[#allocation5 + $0x1c0] sm:$0xff]  ;;  %v120_v51 = vld [vmem:[#allocation5 + $0x1d0] sm:$0xff] }
  0x80   :  { %507 = vmatprep.subr.bf16.mxu0 %v263_v52  ;;  %671 = vmatprep.subr.bf16.mxu1 %v265_v53  ;;  %v302_v52 = vunpack.c.l.s8.bf16 %v118_v50  ;;  %v304_v53 = vunpack.c.l.s8.bf16 %v120_v51 }
  0x83   :  { %508 = vmatpush1.bf16.msra.mxu0 %v262_v56  ;;  %672 = vmatpush1.bf16.msra.mxu1 %v264_v57  ;;  %v123_v56 = vld [vmem:[#allocation5 + $0x1e8] sm:$0xff]  ;;  %v125_v57 = vld [vmem:[#allocation5 + $0x1f8] sm:$0xff] }
  0x84   :  { %509 = vmatprep.subr.bf16.mxu0 %v267_v58  ;;  %673 = vmatprep.subr.bf16.mxu1 %v269_v59  ;;  %v306_v58 = vunpack.c.h.s8.bf16 %v118_v50  ;;  %v308_v59 = vunpack.c.h.s8.bf16 %v120_v51  ;;  %v311_v60 = vunpack.c.l.s8.bf16 %v123_v56  ;;  %v313_v61 = vunpack.c.l.s8.bf16 %v125_v57  ;;  %v138_v50 = vld [vmem:[#allocation5 + $0x260] sm:$0xff]  ;;  %v140_v51 = vld [vmem:[#allocation5 + $0x270] sm:$0xff] }
  0x85   :  { %v315_v2 = vunpack.c.h.s8.bf16 %v123_v56  ;;  %v317_v3 = vunpack.c.h.s8.bf16 %v125_v57  ;;  %v143_v56 = vld [vmem:[#allocation5 + $0x288] sm:$0xff]  ;;  %v145_v57 = vld [vmem:[#allocation5 + $0x298] sm:$0xff] }
  0x87   :  { %510 = vmatpush1.bf16.msra.mxu0 %v266_v62  ;;  %674 = vmatpush1.bf16.msra.mxu1 %v268_v63  ;;  %v122_v62 = vld [vmem:[#allocation5 + $0x1e0] sm:$0xff]  ;;  %v124_v63 = vld [vmem:[#allocation5 + $0x1f0] sm:$0xff] }
  0x88   :  { %511 = vmatprep.subr.bf16.mxu0 %v271_v0  ;;  %675 = vmatprep.subr.bf16.mxu1 %v273_v1  ;;  %v310_v0 = vunpack.c.l.s8.bf16 %v122_v62  ;;  %v312_v1 = vunpack.c.l.s8.bf16 %v124_v63 }
  0x8b   :  { %512 = vmatpush1.bf16.msra.mxu0 %v270_v4  ;;  %676 = vmatpush1.bf16.msra.mxu1 %v272_v5  ;;  %v127_v4 = vld [vmem:[#allocation5 + $0x208] sm:$0xff]  ;;  %v129_v5 = vld [vmem:[#allocation5 + $0x218] sm:$0xff] }
  0x8c   :  { %513 = vmatprep.subr.bf16.mxu0 %v275_v6  ;;  %677 = vmatprep.subr.bf16.mxu1 %v277_v7  ;;  %v314_v6 = vunpack.c.h.s8.bf16 %v122_v62  ;;  %v316_v7 = vunpack.c.h.s8.bf16 %v124_v63  ;;  %v319_v9 = vunpack.c.l.s8.bf16 %v127_v4  ;;  %v142_v62 = vld [vmem:[#allocation5 + $0x280] sm:$0xff]  ;;  %v144_v63 = vld [vmem:[#allocation5 + $0x290] sm:$0xff] }
  0x8f   :  { %514 = vmatpush1.bf16.msra.mxu0 %v274_v10  ;;  %678 = vmatpush1.bf16.msra.mxu1 %v276_v11  ;;  %v321_v10 = vunpack.c.l.s8.bf16 %v129_v5  ;;  %v126_v11 = vld [vmem:[#allocation5 + $0x200] sm:$0xff] }
  0x90   :  { %515 = vmatprep.subr.bf16.mxu0 %v279_v12  ;;  %679 = vmatprep.subr.bf16.mxu1 %v281_v13  ;;  %v128_v12 = vld [vmem:[#allocation5 + $0x210] sm:$0xff]  ;;  %v456_v13 = vpack.c.bf16 %v448_v8, %v448_v8  ;;  %v318_v15 = vunpack.c.l.s8.bf16 %v126_v11 }
  0x93   :  { %516 = vmatpush1.bf16.msra.mxu0 %v278_v16  ;;  %680 = vmatpush1.bf16.msra.mxu1 %v280_v17  ;;  %v320_v16 = vunpack.c.l.s8.bf16 %v128_v12  ;;  %v323_v17 = vunpack.c.h.s8.bf16 %v127_v4  ;;  %v147_v4 = vld [vmem:[#allocation5 + $0x2a8] sm:$0xff] }
  0x94   :  { %517 = vmatprep.subr.bf16.mxu0 %v283_v18  ;;  %681 = vmatprep.subr.bf16.mxu1 %v285_v19  ;;  %v325_v18 = vunpack.c.h.s8.bf16 %v129_v5  ;;  %v131_v19 = vld [vmem:[#allocation5 + $0x228] sm:$0xff]  ;;  %v149_v5 = vld [vmem:[#allocation5 + $0x2b8] sm:$0xff]  ;;  %v359_v8 = vunpack.c.l.s8.bf16 %v147_v4  ;;  %v363_v14 = vunpack.c.h.s8.bf16 %v147_v4 }
  0x95   :  { %v167_v4 = vld [vmem:[#allocation5 + $0x348] sm:$0xff] }
  0x97   :  { %518 = vmatpush1.bf16.msra.mxu0 %v282_v22  ;;  %682 = vmatpush1.bf16.msra.mxu1 %v284_v23  ;;  %v322_v22 = vunpack.c.h.s8.bf16 %v126_v11  ;;  %v324_v23 = vunpack.c.h.s8.bf16 %v128_v12  ;;  %v148_v11 = vld [vmem:[#allocation5 + $0x2b0] sm:$0xff] }
  0x98   :  { %519 = vmatprep.subr.bf16.mxu0 %v287_v24  ;;  %683 = vmatprep.subr.bf16.mxu1 %v289_v25  ;;  %v327_v24 = vunpack.c.l.s8.bf16 %v131_v19  ;;  %v329_v25 = vunpack.c.l.s8.bf16 %v133_v20 }
  0x9b   :  { %520 = vmatpush1.bf16.msra.mxu0 %v286_v28  ;;  %684 = vmatpush1.bf16.msra.mxu1 %v288_v29  ;;  %v326_v28 = vunpack.c.l.s8.bf16 %v130_v26  ;;  %v328_v29 = vunpack.c.l.s8.bf16 %v132_v27 }
  0x9c   :  { %521 = vmatprep.subr.bf16.mxu0 %v291_v30  ;;  %685 = vmatprep.subr.bf16.mxu1 %v293_v31  ;;  %v331_v30 = vunpack.c.h.s8.bf16 %v131_v19  ;;  %v333_v31 = vunpack.c.h.s8.bf16 %v133_v20  ;;  %v364_v19 = vunpack.c.h.s8.bf16 %v148_v11 }
  0x9f   :  { %522 = vmatpush1.bf16.msra.mxu0 %v290_v34  ;;  %686 = vmatpush1.bf16.msra.mxu1 %v292_v35  ;;  %v330_v34 = vunpack.c.h.s8.bf16 %v130_v26  ;;  %v332_v35 = vunpack.c.h.s8.bf16 %v132_v27 }
  0xa0   :  { %523 = vmatprep.subr.bf16.mxu0 %v295_v36  ;;  %687 = vmatprep.subr.bf16.mxu1 %v297_v37  ;;  %v335_v36 = vunpack.c.l.s8.bf16 %v135_v32  ;;  %v337_v37 = vunpack.c.l.s8.bf16 %v137_v33 }
  0xa3   :  { %524 = vmatpush1.bf16.msra.mxu0 %v294_v40  ;;  %688 = vmatpush1.bf16.msra.mxu1 %v296_v41  ;;  %v334_v40 = vunpack.c.l.s8.bf16 %v134_v38  ;;  %v336_v41 = vunpack.c.l.s8.bf16 %v136_v39 }
  0xa4   :  { %525 = vmatprep.subr.bf16.mxu0 %v299_v42  ;;  %689 = vmatprep.subr.bf16.mxu1 %v301_v43  ;;  %v339_v42 = vunpack.c.h.s8.bf16 %v135_v32  ;;  %v341_v43 = vunpack.c.h.s8.bf16 %v137_v33 }
  0xa7   :  { %526 = vmatpush1.bf16.msra.mxu0 %v298_v46  ;;  %690 = vmatpush1.bf16.msra.mxu1 %v300_v47  ;;  %v338_v46 = vunpack.c.h.s8.bf16 %v134_v38  ;;  %v340_v47 = vunpack.c.h.s8.bf16 %v136_v39 }
  0xa8   :  { %527 = vmatprep.subr.bf16.mxu0 %v303_v48  ;;  %691 = vmatprep.subr.bf16.mxu1 %v305_v49  ;;  %v343_v48 = vunpack.c.l.s8.bf16 %v139_v44  ;;  %v345_v49 = vunpack.c.l.s8.bf16 %v141_v45 }
  0xab   :  { %528 = vmatpush1.bf16.msra.mxu0 %v302_v52  ;;  %692 = vmatpush1.bf16.msra.mxu1 %v304_v53  ;;  %v342_v52 = vunpack.c.l.s8.bf16 %v138_v50  ;;  %v344_v53 = vunpack.c.l.s8.bf16 %v140_v51 }
  0xac   :  { %529 = vmatprep.subr.bf16.mxu0 %v307_v54  ;;  %693 = vmatprep.subr.bf16.mxu1 %v309_v55  ;;  %v347_v54 = vunpack.c.h.s8.bf16 %v139_v44  ;;  %v349_v55 = vunpack.c.h.s8.bf16 %v141_v45  ;;  %v450_v44 = vld [vmem:[#allocation2 + $0x20] sm:$0xff] }
  0xaf   :  { %530 = vmatpush1.bf16.msra.mxu0 %v306_v58  ;;  %694 = vmatpush1.bf16.msra.mxu1 %v308_v59  ;;  %v346_v58 = vunpack.c.h.s8.bf16 %v138_v50  ;;  %v348_v59 = vunpack.c.h.s8.bf16 %v140_v51  ;;  %v453_v50 = vld [vmem:[#allocation2 + $0x38] sm:$0xff] }
  0xb0   :  { %531 = vmatprep.subr.bf16.mxu0 %v311_v60  ;;  %695 = vmatprep.subr.bf16.mxu1 %v313_v61  ;;  %v351_v60 = vunpack.c.l.s8.bf16 %v143_v56  ;;  %v353_v61 = vunpack.c.l.s8.bf16 %v145_v57 }
  0xb3   :  { %532 = vmatpush1.bf16.msra.mxu0 %v310_v0  ;;  %696 = vmatpush1.bf16.msra.mxu1 %v312_v1  ;;  %v350_v0 = vunpack.c.l.s8.bf16 %v142_v62  ;;  %v352_v1 = vunpack.c.l.s8.bf16 %v144_v63 }
  0xb4   :  { %533 = vmatprep.subr.bf16.mxu0 %v315_v2  ;;  %697 = vmatprep.subr.bf16.mxu1 %v317_v3  ;;  %v355_v2 = vunpack.c.h.s8.bf16 %v143_v56  ;;  %v357_v3 = vunpack.c.h.s8.bf16 %v145_v57  ;;  %v165_v56 = vld [vmem:[#allocation5 + $0x338] sm:$0xff]  ;;  %v461_v57 = vpack.c.bf16 %v453_v50, %v453_v50 }
  0xb7   :  { %534 = vmatpush1.bf16.msra.mxu0 %v314_v6  ;;  %698 = vmatpush1.bf16.msra.mxu1 %v316_v7  ;;  %v354_v6 = vunpack.c.h.s8.bf16 %v142_v62  ;;  %v356_v7 = vunpack.c.h.s8.bf16 %v144_v63  ;;  %v162_v62 = vld [vmem:[#allocation5 + $0x320] sm:$0xff]  ;;  %v164_v63 = vld [vmem:[#allocation5 + $0x330] sm:$0xff] }
  0xb8   :  { %544 = vmatprep.subr.bf16.mxu0 %v319_v9  ;;  %708 = vmatprep.subr.bf16.mxu1 %v321_v10  ;;  %v361_v9 = vunpack.c.l.s8.bf16 %v149_v5  ;;  %v146_v10 = vld [vmem:[#allocation5 + $0x2a0] sm:$0xff] }
  0xb9   :  { %v358_v12 = vunpack.c.l.s8.bf16 %v146_v10 }
  0xba   :  { %536 = vmatmul.mubr.bf16.vlgmr.msra.gmra.mrb[0].mxu0 %v456_v13  ;;  %700 = vmatmul.mubr.bf16.vlgmr.msra.gmra.mrb[0].mxu1 %v456_v13  ;;  %v360_v13 = vunpack.c.l.s8.bf16 %v148_v11  ;;  %v168_v11 = vld [vmem:[#allocation5 + $0x350] sm:$0xff] }
  0xbb   :  { %545 = vmatpush1.bf16.msra.mxu0 %v318_v15  ;;  %709 = vmatpush1.bf16.msra.mxu1 %v320_v16  ;;  %v365_v15 = vunpack.c.h.s8.bf16 %v149_v5  ;;  %v151_v16 = vld [vmem:[#allocation5 + $0x2c8] sm:$0xff]  ;;  %v169_v5 = vld [vmem:[#allocation5 + $0x358] sm:$0xff] }
  0xbc   :  { %546 = vmatprep.subr.bf16.mxu0 %v323_v17  ;;  %710 = vmatprep.subr.bf16.mxu1 %v325_v18  ;;  %v153_v17 = vld [vmem:[#allocation5 + $0x2d8] sm:$0xff]  ;;  %v362_v18 = vunpack.c.h.s8.bf16 %v146_v10  ;;  %v367_v20 = vunpack.c.l.s8.bf16 %v151_v16  ;;  %v371_v26 = vunpack.c.h.s8.bf16 %v151_v16  ;;  %v166_v10 = vld [vmem:[#allocation5 + $0x340] sm:$0xff]  ;;  %v171_v16 = vld [vmem:[#allocation5 + $0x368] sm:$0xff] }
  0xbd   :  { %576 = vmatprep.mubr.bf16.mxu0 %v459_v21  ;;  %740 = vmatprep.mubr.bf16.mxu1 %v459_v21  ;;  %v369_v21 = vunpack.c.l.s8.bf16 %v153_v17  ;;  %v373_v27 = vunpack.c.h.s8.bf16 %v153_v17  ;;  %v173_v17 = vld [vmem:[#allocation5 + $0x378] sm:$0xff] }
  0xbf   :  { %547 = vmatpush1.bf16.msra.mxu0 %v322_v22  ;;  %711 = vmatpush1.bf16.msra.mxu1 %v324_v23  ;;  %v150_v22 = vld [vmem:[#allocation5 + $0x2c0] sm:$0xff]  ;;  %v152_v23 = vld [vmem:[#allocation5 + $0x2d0] sm:$0xff] }
  0xc0   :  { %548 = vmatprep.subr.bf16.mxu0 %v327_v24  ;;  %712 = vmatprep.subr.bf16.mxu1 %v329_v25  ;;  %v366_v24 = vunpack.c.l.s8.bf16 %v150_v22  ;;  %v368_v25 = vunpack.c.l.s8.bf16 %v152_v23 }
  0xc3   :  { %549 = vmatpush1.bf16.msra.mxu0 %v326_v28  ;;  %713 = vmatpush1.bf16.msra.mxu1 %v328_v29  ;;  %v155_v28 = vld [vmem:[#allocation5 + $0x2e8] sm:$0xff]  ;;  %v157_v29 = vld [vmem:[#allocation5 + $0x2f8] sm:$0xff] }
  0xc4   :  { %550 = vmatprep.subr.bf16.mxu0 %v331_v30  ;;  %714 = vmatprep.subr.bf16.mxu1 %v333_v31  ;;  %v370_v30 = vunpack.c.h.s8.bf16 %v150_v22  ;;  %v372_v31 = vunpack.c.h.s8.bf16 %v152_v23  ;;  %v375_v32 = vunpack.c.l.s8.bf16 %v155_v28  ;;  %v377_v33 = vunpack.c.l.s8.bf16 %v157_v29  ;;  %v170_v22 = vld [vmem:[#allocation5 + $0x360] sm:$0xff]  ;;  %v172_v23 = vld [vmem:[#allocation5 + $0x370] sm:$0xff] }
  0xc5   :  { %v379_v38 = vunpack.c.h.s8.bf16 %v155_v28  ;;  %v381_v39 = vunpack.c.h.s8.bf16 %v157_v29  ;;  %v175_v28 = vld [vmem:[#allocation5 + $0x388] sm:$0xff]  ;;  %v177_v29 = vld [vmem:[#allocation5 + $0x398] sm:$0xff] }
  0xc7   :  { %551 = vmatpush1.bf16.msra.mxu0 %v330_v34  ;;  %715 = vmatpush1.bf16.msra.mxu1 %v332_v35  ;;  %v154_v34 = vld [vmem:[#allocation5 + $0x2e0] sm:$0xff]  ;;  %v156_v35 = vld [vmem:[#allocation5 + $0x2f0] sm:$0xff] }
  0xc8   :  { %552 = vmatprep.subr.bf16.mxu0 %v335_v36  ;;  %716 = vmatprep.subr.bf16.mxu1 %v337_v37  ;;  %v374_v36 = vunpack.c.l.s8.bf16 %v154_v34  ;;  %v376_v37 = vunpack.c.l.s8.bf16 %v156_v35 }
  0xcb   :  { %553 = vmatpush1.bf16.msra.mxu0 %v334_v40  ;;  %717 = vmatpush1.bf16.msra.mxu1 %v336_v41  ;;  %v159_v40 = vld [vmem:[#allocation5 + $0x308] sm:$0xff]  ;;  %v161_v41 = vld [vmem:[#allocation5 + $0x318] sm:$0xff] }
  0xcc   :  { %554 = vmatprep.subr.bf16.mxu0 %v339_v42  ;;  %718 = vmatprep.subr.bf16.mxu1 %v341_v43  ;;  %v378_v42 = vunpack.c.h.s8.bf16 %v154_v34  ;;  %v380_v43 = vunpack.c.h.s8.bf16 %v156_v35  ;;  %v383_v45 = vunpack.c.l.s8.bf16 %v159_v40  ;;  %v174_v34 = vld [vmem:[#allocation5 + $0x380] sm:$0xff]  ;;  %v176_v35 = vld [vmem:[#allocation5 + $0x390] sm:$0xff] }
  0xcf   :  { %555 = vmatpush1.bf16.msra.mxu0 %v338_v46  ;;  %719 = vmatpush1.bf16.msra.mxu1 %v340_v47  ;;  %v385_v46 = vunpack.c.l.s8.bf16 %v161_v41  ;;  %v158_v47 = vld [vmem:[#allocation5 + $0x300] sm:$0xff] }
  0xd0   :  { %556 = vmatprep.subr.bf16.mxu0 %v343_v48  ;;  %720 = vmatprep.subr.bf16.mxu1 %v345_v49  ;;  %v160_v48 = vld [vmem:[#allocation5 + $0x310] sm:$0xff]  ;;  %v458_v49 = vpack.c.bf16 %v450_v44, %v450_v44  ;;  %v382_v51 = vunpack.c.l.s8.bf16 %v158_v47 }
  0xd3   :  { %557 = vmatpush1.bf16.msra.mxu0 %v342_v52  ;;  %721 = vmatpush1.bf16.msra.mxu1 %v344_v53  ;;  %v384_v52 = vunpack.c.l.s8.bf16 %v160_v48  ;;  %v387_v53 = vunpack.c.h.s8.bf16 %v159_v40  ;;  %v179_v40 = vld [vmem:[#allocation5 + $0x3a8] sm:$0xff] }
  0xd4   :  { %558 = vmatprep.subr.bf16.mxu0 %v347_v54  ;;  %722 = vmatprep.subr.bf16.mxu1 %v349_v55  ;;  %v389_v54 = vunpack.c.h.s8.bf16 %v161_v41  ;;  %v163_v55 = vld [vmem:[#allocation5 + $0x328] sm:$0xff]  ;;  %v181_v41 = vld [vmem:[#allocation5 + $0x3b8] sm:$0xff]  ;;  %v423_v44 = vunpack.c.l.s8.bf16 %v179_v40  ;;  %v427_v50 = vunpack.c.h.s8.bf16 %v179_v40  ;;  %v1603_v40 = vld [vmem:[#allocation7 + $0x70] sm:$0xff]  }
  0xd7   :  { %559 = vmatpush1.bf16.msra.mxu0 %v346_v58  ;;  %723 = vmatpush1.bf16.msra.mxu1 %v348_v59  ;;  %v386_v58 = vunpack.c.h.s8.bf16 %v158_v47  ;;  %v388_v59 = vunpack.c.h.s8.bf16 %v160_v48  ;;  %v180_v47 = vld [vmem:[#allocation5 + $0x3b0] sm:$0xff] }
  0xd8   :  { %560 = vmatprep.subr.bf16.mxu0 %v351_v60  ;;  %724 = vmatprep.subr.bf16.mxu1 %v353_v61  ;;  %v391_v60 = vunpack.c.l.s8.bf16 %v163_v55  ;;  %v393_v61 = vunpack.c.l.s8.bf16 %v165_v56 }
  0xdb   :  { %561 = vmatpush1.bf16.msra.mxu0 %v350_v0  ;;  %725 = vmatpush1.bf16.msra.mxu1 %v352_v1  ;;  %v390_v0 = vunpack.c.l.s8.bf16 %v162_v62  ;;  %v392_v1 = vunpack.c.l.s8.bf16 %v164_v63 }
  0xdc   :  { %562 = vmatprep.subr.bf16.mxu0 %v355_v2  ;;  %726 = vmatprep.subr.bf16.mxu1 %v357_v3  ;;  %v395_v2 = vunpack.c.h.s8.bf16 %v163_v55  ;;  %v397_v3 = vunpack.c.h.s8.bf16 %v165_v56  ;;  %v428_v55 = vunpack.c.h.s8.bf16 %v180_v47 }
  0xdf   :  { %563 = vmatpush1.bf16.msra.mxu0 %v354_v6  ;;  %727 = vmatpush1.bf16.msra.mxu1 %v356_v7  ;;  %v394_v6 = vunpack.c.h.s8.bf16 %v162_v62  ;;  %v396_v7 = vunpack.c.h.s8.bf16 %v164_v63 }
  0xe0   :  { %564 = vmatprep.subr.bf16.mxu0 %v359_v8  ;;  %728 = vmatprep.subr.bf16.mxu1 %v361_v9  ;;  %v399_v8 = vunpack.c.l.s8.bf16 %v167_v4  ;;  %v401_v9 = vunpack.c.l.s8.bf16 %v169_v5 }
  0xe3   :  { %565 = vmatpush1.bf16.msra.mxu0 %v358_v12  ;;  %729 = vmatpush1.bf16.msra.mxu1 %v360_v13  ;;  %v398_v12 = vunpack.c.l.s8.bf16 %v166_v10  ;;  %v400_v13 = vunpack.c.l.s8.bf16 %v168_v11 }
  0xe4   :  { %566 = vmatprep.subr.bf16.mxu0 %v363_v14  ;;  %730 = vmatprep.subr.bf16.mxu1 %v365_v15  ;;  %v403_v14 = vunpack.c.h.s8.bf16 %v167_v4  ;;  %v405_v15 = vunpack.c.h.s8.bf16 %v169_v5 }
  0xe7   :  { %567 = vmatpush1.bf16.msra.mxu0 %v362_v18  ;;  %731 = vmatpush1.bf16.msra.mxu1 %v364_v19  ;;  %v402_v18 = vunpack.c.h.s8.bf16 %v166_v10  ;;  %v404_v19 = vunpack.c.h.s8.bf16 %v168_v11 }
  0xe8   :  { %568 = vmatprep.subr.bf16.mxu0 %v367_v20  ;;  %732 = vmatprep.subr.bf16.mxu1 %v369_v21  ;;  %v407_v20 = vunpack.c.l.s8.bf16 %v171_v16  ;;  %v409_v21 = vunpack.c.l.s8.bf16 %v173_v17 }
  0xeb   :  { %569 = vmatpush1.bf16.msra.mxu0 %v366_v24  ;;  %733 = vmatpush1.bf16.msra.mxu1 %v368_v25  ;;  %v406_v24 = vunpack.c.l.s8.bf16 %v170_v22  ;;  %v408_v25 = vunpack.c.l.s8.bf16 %v172_v23 }
  0xec   :  { %570 = vmatprep.subr.bf16.mxu0 %v371_v26  ;;  %734 = vmatprep.subr.bf16.mxu1 %v373_v27  ;;  %v411_v26 = vunpack.c.h.s8.bf16 %v171_v16  ;;  %v413_v27 = vunpack.c.h.s8.bf16 %v173_v17  ;;  %v1579_v16 = vld [vmem:[#allocation7 + $0x40] sm:$0xff]  }
  0xed   :  { %v1580_v17 = vld [vmem:[#allocation7 + $0xc0] sm:$0xff]  }
  0xef   :  { %571 = vmatpush1.bf16.msra.mxu0 %v370_v30  ;;  %735 = vmatpush1.bf16.msra.mxu1 %v372_v31  ;;  %v410_v30 = vunpack.c.h.s8.bf16 %v170_v22  ;;  %v412_v31 = vunpack.c.h.s8.bf16 %v172_v23  ;;  %v1585_v22 = vld [vmem:[#allocation7 + $0x8] sm:$0xff]  }
  0xf0   :  { %572 = vmatprep.subr.bf16.mxu0 %v375_v32  ;;  %736 = vmatprep.subr.bf16.mxu1 %v377_v33  ;;  %v415_v32 = vunpack.c.l.s8.bf16 %v175_v28  ;;  %v417_v33 = vunpack.c.l.s8.bf16 %v177_v29  ;;  %v1586_v23 = vld [vmem:[#allocation7 + $0x88] sm:$0xff]  }
  0xf3   :  { %573 = vmatpush1.bf16.msra.mxu0 %v374_v36  ;;  %737 = vmatpush1.bf16.msra.mxu1 %v376_v37  ;;  %v414_v36 = vunpack.c.l.s8.bf16 %v174_v34  ;;  %v416_v37 = vunpack.c.l.s8.bf16 %v176_v35 }
  0xf4   :  { %574 = vmatprep.subr.bf16.mxu0 %v379_v38  ;;  %738 = vmatprep.subr.bf16.mxu1 %v381_v39  ;;  %v419_v38 = vunpack.c.h.s8.bf16 %v175_v28  ;;  %v421_v39 = vunpack.c.h.s8.bf16 %v177_v29  ;;  %v1591_v28 = vld [vmem:[#allocation7 + $0x58] sm:$0xff]  }
  0xf5   :  { %v1592_v29 = vld [vmem:[#allocation7 + $0xd8] sm:$0xff]  }
  0xf7   :  { %575 = vmatpush1.bf16.msra.mxu0 %v378_v42  ;;  %739 = vmatpush1.bf16.msra.mxu1 %v380_v43  ;;  %v418_v42 = vunpack.c.h.s8.bf16 %v174_v34  ;;  %v420_v43 = vunpack.c.h.s8.bf16 %v176_v35  ;;  %v1597_v34 = vld [vmem:[#allocation7 + $0x20] sm:$0xff]  }
  0xf8   :  { %585 = vmatprep.subr.bf16.mxu0 %v383_v45  ;;  %749 = vmatprep.subr.bf16.mxu1 %v385_v46  ;;  %v425_v45 = vunpack.c.l.s8.bf16 %v181_v41  ;;  %v178_v46 = vld [vmem:[#allocation5 + $0x3a0] sm:$0xff] }
  0xf9   :  { %v422_v48 = vunpack.c.l.s8.bf16 %v178_v46  ;;  %v1598_v35 = vld [vmem:[#allocation7 + $0xa0] sm:$0xff]  }
  0xfa   :  { %577 = vmatmul.mubr.bf16.vlgmr.msra.gmra.mrb[0].mxu0 %v458_v49  ;;  %741 = vmatmul.mubr.bf16.vlgmr.msra.gmra.mrb[0].mxu1 %v458_v49  ;;  %v424_v49 = vunpack.c.l.s8.bf16 %v180_v47  ;;  %v1610_v47 = vld [vmem:[#allocation7 + $0xb8] sm:$0xff]  }
  0xfb   :  { %586 = vmatpush1.bf16.msra.mxu0 %v382_v51  ;;  %750 = vmatpush1.bf16.msra.mxu1 %v384_v52  ;;  %v429_v51 = vunpack.c.h.s8.bf16 %v181_v41  ;;  %v183_v52 = vld [vmem:[#allocation5 + $0x3c8] sm:$0xff]  ;;  %v1604_v41 = vld [vmem:[#allocation7 + $0xf0] sm:$0xff]  }
  0xfc   :  { %587 = vmatprep.subr.bf16.mxu0 %v387_v53  ;;  %751 = vmatprep.subr.bf16.mxu1 %v389_v54  ;;  %v185_v53 = vld [vmem:[#allocation5 + $0x3d8] sm:$0xff]  ;;  %v426_v54 = vunpack.c.h.s8.bf16 %v178_v46  ;;  %v431_v56 = vunpack.c.l.s8.bf16 %v183_v52  ;;  %v435_v62 = vunpack.c.h.s8.bf16 %v183_v52  ;;  %v58_v52 = vld [vmem:[%s1849_s3] sm:$0xf] }
  0xfd   :  { %617 = vmatprep.mubr.bf16.mxu0 %v461_v57  ;;  %781 = vmatprep.mubr.bf16.mxu1 %v461_v57  ;;  %v433_v57 = vunpack.c.l.s8.bf16 %v185_v53  ;;  %v437_v63 = vunpack.c.h.s8.bf16 %v185_v53  ;;  %v1609_v46 = vld [vmem:[#allocation7 + $0x38] sm:$0xff]  }
  0xff   :  { %588 = vmatpush1.bf16.msra.mxu0 %v386_v58  ;;  %752 = vmatpush1.bf16.msra.mxu1 %v388_v59  ;;  %v182_v58 = vld [vmem:[#allocation5 + $0x3c0] sm:$0xff]  ;;  %v184_v59 = vld [vmem:[#allocation5 + $0x3d0] sm:$0xff] }
 0x100   :  { %589 = vmatprep.subr.bf16.mxu0 %v391_v60  ;;  %753 = vmatprep.subr.bf16.mxu1 %v393_v61  ;;  %v430_v60 = vunpack.c.l.s8.bf16 %v182_v58  ;;  %v432_v61 = vunpack.c.l.s8.bf16 %v184_v59 }
 0x103   :  { %590 = vmatpush1.bf16.msra.mxu0 %v390_v0  ;;  %754 = vmatpush1.bf16.msra.mxu1 %v392_v1  ;;  %v187_v0 = vld [vmem:[#allocation5 + $0x3e8] sm:$0xff]  ;;  %v189_v1 = vld [vmem:[#allocation5 + $0x3f8] sm:$0xff] }
 0x104   :  { %591 = vmatprep.subr.bf16.mxu0 %v395_v2  ;;  %755 = vmatprep.subr.bf16.mxu1 %v397_v3  ;;  %v434_v2 = vunpack.c.h.s8.bf16 %v182_v58  ;;  %v436_v3 = vunpack.c.h.s8.bf16 %v184_v59  ;;  %v439_v4 = vunpack.c.l.s8.bf16 %v187_v0  ;;  %v441_v5 = vunpack.c.l.s8.bf16 %v189_v1 }
 0x105   :  { %v443_v10 = vunpack.c.h.s8.bf16 %v187_v0  ;;  %v445_v11 = vunpack.c.h.s8.bf16 %v189_v1 }
 0x107   :  { %592 = vmatpush1.bf16.msra.mxu0 %v394_v6  ;;  %756 = vmatpush1.bf16.msra.mxu1 %v396_v7  ;;  %v186_v6 = vld [vmem:[#allocation5 + $0x3e0] sm:$0xff]  ;;  %v188_v7 = vld [vmem:[#allocation5 + $0x3f0] sm:$0xff] }
 0x108   :  { %593 = vmatprep.subr.bf16.mxu0 %v399_v8  ;;  %757 = vmatprep.subr.bf16.mxu1 %v401_v9  ;;  %v438_v8 = vunpack.c.l.s8.bf16 %v186_v6  ;;  %v440_v9 = vunpack.c.l.s8.bf16 %v188_v7 }
 0x10b   :  { %594 = vmatpush1.bf16.msra.mxu0 %v398_v12  ;;  %758 = vmatpush1.bf16.msra.mxu1 %v400_v13  ;;  %v442_v12 = vunpack.c.h.s8.bf16 %v186_v6  ;;  %v444_v13 = vunpack.c.h.s8.bf16 %v188_v7 }
 0x10c   :  { %595 = vmatprep.subr.bf16.mxu0 %v403_v14  ;;  %759 = vmatprep.subr.bf16.mxu1 %v405_v15  ;;  %v452_v14 = vld [vmem:[#allocation2 + $0x30] sm:$0xff] }
 0x10d   :  { %v460_v15 = vpack.c.bf16 %v452_v14, %v452_v14 }
 0x10f   :  { %596 = vmatpush1.bf16.msra.mxu0 %v402_v18  ;;  %760 = vmatpush1.bf16.msra.mxu1 %v404_v19  ;;  %v1581_v18 = vld [vmem:[#allocation7] sm:$0xff]  }
 0x110   :  { %597 = vmatprep.subr.bf16.mxu0 %v407_v20  ;;  %761 = vmatprep.subr.bf16.mxu1 %v409_v21  ;;  %v1582_v19 = vld [vmem:[#allocation7 + $0x80] sm:$0xff]   ;;  %v1583_v20 = vld [vmem:[#allocation7 + $0x48] sm:$0xff]  }
 0x111   :  { %v1584_v21 = vld [vmem:[#allocation7 + $0xc8] sm:$0xff]  }
 0x113   :  { %598 = vmatpush1.bf16.msra.mxu0 %v406_v24  ;;  %762 = vmatpush1.bf16.msra.mxu1 %v408_v25  ;;  %v1587_v24 = vld [vmem:[#allocation7 + $0x50] sm:$0xff]  }
 0x114   :  { %599 = vmatprep.subr.bf16.mxu0 %v411_v26  ;;  %763 = vmatprep.subr.bf16.mxu1 %v413_v27  ;;  %v1588_v25 = vld [vmem:[#allocation7 + $0xd0] sm:$0xff]  }
 0x115   :  { %v1589_v26 = vld [vmem:[#allocation7 + $0x10] sm:$0xff]  }
 0x116   :  { %v1590_v27 = vld [vmem:[#allocation7 + $0x90] sm:$0xff]  }
 0x117   :  { %600 = vmatpush1.bf16.msra.mxu0 %v410_v30  ;;  %764 = vmatpush1.bf16.msra.mxu1 %v412_v31  ;;  %v1593_v30 = vld [vmem:[#allocation7 + $0x18] sm:$0xff]  }
 0x118   :  { %601 = vmatprep.subr.bf16.mxu0 %v415_v32  ;;  %765 = vmatprep.subr.bf16.mxu1 %v417_v33  ;;  %v1594_v31 = vld [vmem:[#allocation7 + $0x98] sm:$0xff]   ;;  %v1595_v32 = vld [vmem:[#allocation7 + $0x60] sm:$0xff]  }
 0x119   :  { %v1596_v33 = vld [vmem:[#allocation7 + $0xe0] sm:$0xff]  }
 0x11b   :  { %602 = vmatpush1.bf16.msra.mxu0 %v414_v36  ;;  %766 = vmatpush1.bf16.msra.mxu1 %v416_v37  ;;  %v1599_v36 = vld [vmem:[#allocation7 + $0x68] sm:$0xff]  }
 0x11c   :  { %603 = vmatprep.subr.bf16.mxu0 %v419_v38  ;;  %767 = vmatprep.subr.bf16.mxu1 %v421_v39  ;;  %v1600_v37 = vld [vmem:[#allocation7 + $0xe8] sm:$0xff]  }
 0x11d   :  { %v1601_v38 = vld [vmem:[#allocation7 + $0x28] sm:$0xff]  }
 0x11e   :  { %v1602_v39 = vld [vmem:[#allocation7 + $0xa8] sm:$0xff]  }
 0x11f   :  { %604 = vmatpush1.bf16.msra.mxu0 %v418_v42  ;;  %768 = vmatpush1.bf16.msra.mxu1 %v420_v43  ;;  %v1605_v42 = vld [vmem:[#allocation7 + $0x30] sm:$0xff]  }
 0x120   :  { %605 = vmatprep.subr.bf16.mxu0 %v423_v44  ;;  %769 = vmatprep.subr.bf16.mxu1 %v425_v45  ;;  %v1606_v43 = vld [vmem:[#allocation7 + $0xb0] sm:$0xff]   ;;  %v1607_v44 = vld [vmem:[#allocation7 + $0x78] sm:$0xff]  }
 0x121   :  { %v1608_v45 = vld [vmem:[#allocation7 + $0xf8] sm:$0xff]  }
 0x123   :  { %606 = vmatpush1.bf16.msra.mxu0 %v422_v48  ;;  %770 = vmatpush1.bf16.msra.mxu1 %v424_v49  ;;  %v791_v48 = vlaneseq }
 0x124   :  { %607 = vmatprep.subr.bf16.mxu0 %v427_v50  ;;  %771 = vmatprep.subr.bf16.mxu1 %v429_v51 }
 0x125   :  { %v792_v49 = vshrl.u32 %v791_v48, 7 }
 0x127   :  { %608 = vmatpush1.bf16.msra.mxu0 %v426_v54  ;;  %772 = vmatpush1.bf16.msra.mxu1 %v428_v55  ;;  %v793_v50 = vsub.s32 0, %v792_v49  ;;  %v801_v51 = vsub.s32 2, %v792_v49  ;;  %v797_v53 = vsub.s32 1, %v792_v49  ;;  %v805_v54 = vsub.s32 3, %v792_v49  ;;  %v59_v55 = vld [vmem:[%s1849_s3 + $0x4] sm:$0xf] }
 0x128   :  { %609 = vmatprep.subr.bf16.mxu0 %v431_v56  ;;  %773 = vmatprep.subr.bf16.mxu1 %v433_v57 }
 0x129   :  { %v794_v56 = vrot.slane %v58_v52, %v793_v50  ;;  %v802_v57 = vrot.slane %v58_v52, %v801_v51  ;;  %v798_v58 = vrot.slane %v58_v52, %v797_v53  ;;  %v806_v59 = vrot.slane %v58_v52, %v805_v54 }
 0x12a   :  { %v823_v0 = vrot.slane %v59_v55, %v797_v53  ;;  %v831_v1 = vrot.slane %v59_v55, %v805_v54 }
 0x12b   :  { %610 = vmatpush1.bf16.msra.mxu0 %v430_v60  ;;  %774 = vmatpush1.bf16.msra.mxu1 %v432_v61  ;;  %v819_v60 = vrot.slane %v59_v55, %v793_v50  ;;  %v827_v61 = vrot.slane %v59_v55, %v801_v51 }
 0x12c   :  { %611 = vmatprep.subr.bf16.mxu0 %v435_v62  ;;  %775 = vmatprep.subr.bf16.mxu1 %v437_v63 }
 0x12f   :  { %612 = vmatpush1.bf16.msra.mxu0 %v434_v2  ;;  %776 = vmatpush1.bf16.msra.mxu1 %v436_v3 }
 0x130   :  { %613 = vmatprep.subr.bf16.mxu0 %v439_v4  ;;  %777 = vmatprep.subr.bf16.mxu1 %v441_v5 }
 0x133   :  { %614 = vmatpush1.bf16.msra.mxu0 %v438_v8  ;;  %778 = vmatpush1.bf16.msra.mxu1 %v440_v9 }
 0x134   :  { %615 = vmatprep.subr.bf16.mxu0 %v443_v10  ;;  %779 = vmatprep.subr.bf16.mxu1 %v445_v11 }
 0x137   :  { %616 = vmatpush1.bf16.msra.mxu0 %v442_v12  ;;  %780 = vmatpush1.bf16.msra.mxu1 %v444_v13 }
 0x138   :  { %1472 = vmatprep.subr.bf16.mxu0 %v1579_v16  ;;  %1494 = vmatprep.subr.bf16.mxu1 %v1580_v17 }
 0x13a   :  { %618 = vmatmul.mubr.bf16.vlgmr.msra.gmra.mrb[0].mxu0 %v460_v15  ;;  %782 = vmatmul.mubr.bf16.vlgmr.msra.gmra.mrb[0].mxu1 %v460_v15 }
 0x13b   :  { %1473 = vmatpush3.bf16.msra.mxu0 %v1581_v18  ;;  %1495 = vmatpush3.bf16.msra.mxu1 %v1582_v19 }
 0x13c   :  { %1474 = vmatprep.subr.bf16.mxu0 %v1583_v20  ;;  %1496 = vmatprep.subr.bf16.mxu1 %v1584_v21 }
 0x13f   :  { %1475 = vmatpush3.bf16.msra.mxu0 %v1585_v22  ;;  %1497 = vmatpush3.bf16.msra.mxu1 %v1586_v23 }
 0x140   :  { %1476 = vmatprep.subr.bf16.mxu0 %v1587_v24  ;;  %1498 = vmatprep.subr.bf16.mxu1 %v1588_v25 }
 0x143   :  { %1477 = vmatpush3.bf16.msra.mxu0 %v1589_v26  ;;  %1499 = vmatpush3.bf16.msra.mxu1 %v1590_v27 }
 0x144   :  { %1478 = vmatprep.subr.bf16.mxu0 %v1591_v28  ;;  %1500 = vmatprep.subr.bf16.mxu1 %v1592_v29 }
 0x147   :  { %1479 = vmatpush3.bf16.msra.mxu0 %v1593_v30  ;;  %1501 = vmatpush3.bf16.msra.mxu1 %v1594_v31 }
 0x148   :  { %1480 = vmatprep.subr.bf16.mxu0 %v1595_v32  ;;  %1502 = vmatprep.subr.bf16.mxu1 %v1596_v33 }
 0x14b   :  { %1481 = vmatpush3.bf16.msra.mxu0 %v1597_v34  ;;  %1503 = vmatpush3.bf16.msra.mxu1 %v1598_v35 }
 0x14c   :  { %1482 = vmatprep.subr.bf16.mxu0 %v1599_v36  ;;  %1504 = vmatprep.subr.bf16.mxu1 %v1600_v37 }
 0x14f   :  { %1483 = vmatpush3.bf16.msra.mxu0 %v1601_v38  ;;  %1505 = vmatpush3.bf16.msra.mxu1 %v1602_v39 }
 0x150   :  { %1484 = vmatprep.subr.bf16.mxu0 %v1603_v40  ;;  %1506 = vmatprep.subr.bf16.mxu1 %v1604_v41 }
 0x153   :  { %1485 = vmatpush3.bf16.msra.mxu0 %v1605_v42  ;;  %1507 = vmatpush3.bf16.msra.mxu1 %v1606_v43 }
 0x154   :  { %1486 = vmatprep.subr.bf16.mxu0 %v1607_v44  ;;  %1508 = vmatprep.subr.bf16.mxu1 %v1608_v45 }
 0x157   :  { %1487 = vmatpush3.bf16.msra.mxu0 %v1609_v46  ;;  %1509 = vmatpush3.bf16.msra.mxu1 %v1610_v47 }
 0x20d   :  { %v619_v62 = vpop.f32.mrb[0].mxu0  ;;  %v783_v63 = vpop.f32.mrb[0].mxu1 }
 0x20e   :  { %v811_v2 = vmul.f32 %v794_v56, %v619_v62  ;;  %v813_v3 = vmul.f32 %v802_v57, %v783_v63  ;;  %v621_v4 = vpop.f32.mrb[1].mxu0  ;;  %v785_v5 = vpop.f32.mrb[1].mxu1 }
 0x20f   :  { %v812_v6 = vmul.f32 %v798_v58, %v621_v4  ;;  %v814_v7 = vmul.f32 %v806_v59, %v785_v5  ;;  %v623_v8 = vpop.f32.mrb[2].mxu0  ;;  %v787_v9 = vpop.f32.mrb[2].mxu1 }
 0x210   :  { %v836_v10 = vadd.f32 %v819_v60, %v811_v2  ;;  %v838_v11 = vadd.f32 %v827_v61, %v813_v3  ;;  %v624_v12 = vpop.f32.mrb[3].mxu0  ;;  %v788_v13 = vpop.f32.mrb[3].mxu1 }
 0x211   :  { %v837_v14 = vadd.f32 %v823_v0, %v812_v6  ;;  %v839_v15 = vadd.f32 %v831_v1, %v814_v7 }
 0x212   :  { %v1800_v16 = vmax.f32 %v836_v10, 0.0  ;;  %v1802_v17 = vmax.f32 %v838_v11, 0.0 }
 0x213   :  { %v1804_v18 = vmax.f32 %v837_v14, 0.0  ;;  %v1806_v19 = vmax.f32 %v839_v15, 0.0 }
 0x214   :  { %v844_v20 = vrot.slane %v1800_v16, 4  ;;  %v873_v21 = vmul.f32 %v1800_v16, %v1800_v16  ;;  %v856_v22 = vrot.slane %v1802_v17, 4  ;;  %v875_v23 = vmul.f32 %v1802_v17, %v1802_v17 }
 0x215   :  { %v850_v24 = vrot.slane %v1804_v18, 4  ;;  %v874_v25 = vmul.f32 %v1804_v18, %v1804_v18  ;;  %v862_v26 = vrot.slane %v1806_v19, 4  ;;  %v876_v27 = vmul.f32 %v1806_v19, %v1806_v19 }
 0x216   :  { %v845_v28 = vadd.f32 %v844_v20, %v1800_v16  ;;  %v877_v29 = vrot.slane %v873_v21, 4  ;;  %v857_v30 = vadd.f32 %v856_v22, %v1802_v17  ;;  %v889_v31 = vrot.slane %v875_v23, 4 }
 0x217   :  { %v851_v32 = vadd.f32 %v850_v24, %v1804_v18  ;;  %v883_v33 = vrot.slane %v874_v25, 4  ;;  %v863_v34 = vadd.f32 %v862_v26, %v1806_v19  ;;  %v895_v35 = vrot.slane %v876_v27, 4 }
 0x218   :  { %v846_v36 = vrot.slane %v845_v28, 2  ;;  %v878_v37 = vadd.f32 %v877_v29, %v873_v21  ;;  %v858_v38 = vrot.slane %v857_v30, 2  ;;  %v890_v39 = vadd.f32 %v889_v31, %v875_v23 }
 0x219   :  { %v884_v40 = vadd.f32 %v883_v33, %v874_v25  ;;  %v896_v41 = vadd.f32 %v895_v35, %v876_v27  ;;  %v852_v42 = vrot.slane %v851_v32, 2  ;;  %v864_v43 = vrot.slane %v863_v34, 2 }
 0x21a   :  { %v847_v44 = vadd.f32 %v846_v36, %v845_v28  ;;  %v879_v45 = vrot.slane %v878_v37, 2  ;;  %v859_v46 = vadd.f32 %v858_v38, %v857_v30  ;;  %v891_v47 = vrot.slane %v890_v39, 2 }
 0x21b   :  { %v885_v48 = vrot.slane %v884_v40, 2  ;;  %v897_v49 = vrot.slane %v896_v41, 2  ;;  %v853_v50 = vadd.f32 %v852_v42, %v851_v32  ;;  %v865_v51 = vadd.f32 %v864_v43, %v863_v34 }
 0x21c   :  { %v880_v52 = vadd.f32 %v879_v45, %v878_v37  ;;  %v892_v53 = vadd.f32 %v891_v47, %v890_v39  ;;  %v848_v54 = vrot.slane %v847_v44, 1  ;;  %v860_v55 = vrot.slane %v859_v46, 1 }
 0x21d   :  { %v886_v56 = vadd.f32 %v885_v48, %v884_v40  ;;  %v898_v57 = vadd.f32 %v897_v49, %v896_v41  ;;  %v854_v58 = vrot.slane %v853_v50, 1  ;;  %v866_v59 = vrot.slane %v865_v51, 1 }
 0x21e   :  { %v881_v60 = vrot.slane %v880_v52, 1  ;;  %v893_v61 = vrot.slane %v892_v53, 1  ;;  %v849_v62 = vadd.f32 %v848_v54, %v847_v44  ;;  %v861_v63 = vadd.f32 %v860_v55, %v859_v46  ;;  %v1616_v54 = vld [vmem:[#allocation7 + $0x128] sm:$0xff]   ;;  %v1617_v55 = vld [vmem:[#allocation7 + $0x130] sm:$0xff]  }
 0x21f   :  { %v855_v0 = vadd.f32 %v854_v58, %v853_v50  ;;  %v887_v1 = vrot.slane %v886_v56, 1  ;;  %v867_v2 = vadd.f32 %v866_v59, %v865_v51  ;;  %v899_v3 = vrot.slane %v898_v57, 1  ;;  %v1430_v59 = vld [vmem:[%s1849_s3 + $0x8] ss:$0 sm:$0xff] }
 0x220   :  { %v882_v4 = vadd.f32 %v881_v60, %v880_v52  ;;  %v894_v5 = vadd.f32 %v893_v61, %v892_v53  ;;  %v869_v6 = vmul.f32 0.125, %v849_v62  ;;  %v871_v7 = vmul.f32 0.125, %v861_v63  ;;  %v1614_v52 = vld [vmem:[#allocation7 + $0x118] sm:$0xff]   ;;  %v1615_v53 = vld [vmem:[#allocation7 + $0x120] sm:$0xff]  }
 0x221   :  { %v870_v8 = vmul.f32 0.125, %v855_v0  ;;  %v888_v9 = vadd.f32 %v887_v1, %v886_v56  ;;  %v872_v10 = vmul.f32 0.125, %v867_v2  ;;  %v900_v11 = vadd.f32 %v899_v3, %v898_v57  ;;  %v1618_v56 = vld [vmem:[#allocation7 + $0x138] sm:$0xff]  }
 0x222   :  { %v901_v12 = vmul.f32 0.125, %v882_v4  ;;  %v903_v13 = vmul.f32 0.125, %v894_v5  ;;  %v905_v14 = vmul.f32 %v869_v6, %v869_v6  ;;  %v907_v24 = vmul.f32 %v871_v7, %v871_v7 }
 0x223   :  { %v902_v15 = vmul.f32 0.125, %v888_v9  ;;  %v906_v20 = vmul.f32 %v870_v8, %v870_v8  ;;  %v904_v21 = vmul.f32 0.125, %v900_v11  ;;  %v908_v22 = vmul.f32 %v872_v10, %v872_v10 }
 0x224   :  { %v909_v23 = vsub.f32 %v901_v12, %v905_v14  ;;  %v911_v28 = vsub.f32 %v903_v13, %v907_v24  ;;  %v917_v36 = vsub.f32 %v1800_v16, %v869_v6  ;;  %v918_v38 = vsub.f32 %v1804_v18, %v870_v8  ;;  %v1611_v16 = vld [vmem:[#allocation7 + $0x100] sm:$0xff]  }
 0x225   :  { %v910_v25 = vsub.f32 %v902_v15, %v906_v20  ;;  %v912_v26 = vsub.f32 %v904_v21, %v908_v22  ;;  %v920_v40 = vsub.f32 %v1806_v19, %v872_v10  ;;  %v919_v44 = vsub.f32 %v1802_v17, %v871_v7  ;;  %v1612_v19 = vld [vmem:[#allocation7 + $0x108] sm:$0xff]   ;;  %v1613_v17 = vld [vmem:[#allocation7 + $0x110] sm:$0xff]  }
 0x226   :  { %v913_v27 = vmax.f32 %v909_v23, 0.0  ;;  %v915_v32 = vmax.f32 %v911_v28, 0.0  ;;  %v1730_v18 = vmov 0.0  }
 0x227   :  { %v914_v29 = vmax.f32 %v910_v25, 0.0  ;;  %v916_v30 = vmax.f32 %v912_v26, 0.0  ;;  %1525 = vmatprep.subr.bf16.mxu0 %v1730_v18 }
 0x228   :  { %v921_v31 = vadd.f32 1e-05, %v913_v27  ;;  %v923_v35 = vadd.f32 1e-05, %v915_v32 }
 0x229   :  { %v922_v33 = vadd.f32 1e-05, %v914_v29  ;;  %v924_v34 = vadd.f32 1e-05, %v916_v30 }
 0x22a   :  { %1619 = vrsqrt.f32 %v921_v31 }
 0x22b   :  { %1621 = vrsqrt.f32 %v922_v33 }
 0x22c   :  { %1623 = vrsqrt.f32 %v924_v34  ;;  %v1463_v34 = vld [vmem:[%s1849_s3 + $0x9] ss:$0 sm:$0xff] }
 0x22d   :  { %1625 = vrsqrt.f32 %v923_v35 }
 0x234   :  { %v1620_v37 = vpop.eup %1619 }
 0x235   :  { %v1622_v39 = vpop.eup %1621  ;;  %v929_v41 = vmul.f32 %v1620_v37, %v917_v36 }
 0x236   :  { %v1624_v42 = vpop.eup %1623  ;;  %v930_v43 = vmul.f32 %v1622_v39, %v918_v38 }
 0x237   :  { %v1626_v45 = vpop.eup %1625  ;;  %v932_v46 = vmul.f32 %v1624_v42, %v920_v40  ;;  %v933_v50 = vpack.c.bf16 %v929_v41, %v929_v41 }
 0x238   :  { %v934_v47 = vpack.c.bf16 %v930_v43, %v930_v43  ;;  %v931_v48 = vmul.f32 %v1626_v45, %v919_v44 }
 0x239   :  { %v936_v49 = vpack.c.bf16 %v932_v46, %v932_v46 }
 0x23a   :  { %1231 = vmatprep.mubr.bf16.mxu0 %v934_v47  ;;  %v935_v51 = vpack.c.bf16 %v931_v48, %v931_v48 }
 0x23b   :  { %1271 = vmatprep.mubr.bf16.mxu1 %v936_v49  ;;  %1232 = vmatmul.mubr.bf16.vlgmr.msra.gmra.mrb[4].mxu0 %v933_v50 }
 0x23c   :  { %1272 = vmatmul.mubr.bf16.vlgmr.msra.gmra.mrb[4].mxu1 %v935_v51  ;;  %1526 = vmatpush3.bf16.msra.mxu0 %v1611_v16 }
 0x23d   :  { %1527 = vmatprep.subr.bf16.mxu0 %v1730_v18  ;;  %1541 = vmatprep.mubr.msk.bf16.mxu0 %vm1731_vm0, %v1730_v18 }
 0x240   :  { %1528 = vmatpush3.bf16.msra.mxu0 %v1612_v19 }
 0x241   :  { %1529 = vmatprep.subr.bf16.mxu0 %v1730_v18 }
 0x244   :  { %1530 = vmatpush3.bf16.msra.mxu0 %v1613_v17 }
 0x245   :  { %1531 = vmatprep.subr.bf16.mxu0 %v1730_v18 }
 0x248   :  { %1532 = vmatpush3.bf16.msra.mxu0 %v1614_v52 }
 0x249   :  { %1533 = vmatprep.subr.bf16.mxu0 %v1730_v18 }
 0x24c   :  { %1534 = vmatpush3.bf16.msra.mxu0 %v1615_v53 }
 0x24d   :  { %1535 = vmatprep.subr.bf16.mxu0 %v1730_v18 }
 0x250   :  { %1536 = vmatpush3.bf16.msra.mxu0 %v1616_v54 }
 0x251   :  { %1537 = vmatprep.subr.bf16.mxu0 %v1730_v18 }
 0x254   :  { %1538 = vmatpush3.bf16.msra.mxu0 %v1617_v55 }
 0x255   :  { %1539 = vmatprep.subr.bf16.mxu0 %v1730_v18 }
 0x258   :  { %1540 = vmatpush3.bf16.msra.mxu0 %v1618_v56 }
 0x30e   :  { %v1488_v57 = vpop.f32.mrb[4].mxu0 }
 0x30f   :  { %v1510_v58 = vpop.f32.mrb[4].mxu1  ;;  %v1489_v60 = vpop.f32.mrb[5].mxu0 }
 0x310   :  { %v1490_v61 = vadd.f32 %v1489_v60, %v1488_v57  ;;  %v1511_v62 = vpop.f32.mrb[5].mxu1  ;;  %v1491_v63 = vpop.f32.mrb[6].mxu0 }
 0x311   :  { %v1512_v0 = vadd.f32 %v1511_v62, %v1510_v58  ;;  %v1513_v1 = vpop.f32.mrb[6].mxu1  ;;  %v1492_v2 = vpop.f32.mrb[7].mxu0 }
 0x312   :  { %v1234_v3 = vadd.f32 %v1490_v61, %v1430_v59  ;;  %v1514_v4 = vpop.f32.mrb[7].mxu1 }
 0x314   :  { %v1274_v5 = vadd.f32 %v1512_v0, %v1234_v3 }
 0x316   :  { %v1279_v6 = vmax.f32 %v1274_v5, 0.0 }
 0x318   :  { %v1280_v7 = vrot.slane %v1279_v6, 4  ;;  %v1287_v8 = vmul.f32 %v1279_v6, %v1279_v6 }
 0x31a   :  { %v1281_v9 = vadd.f32 %v1280_v7, %v1279_v6  ;;  %v1288_v10 = vrot.slane %v1287_v8, 4 }
 0x31c   :  { %v1282_v11 = vrot.slane %v1281_v9, 2  ;;  %v1289_v12 = vadd.f32 %v1288_v10, %v1287_v8 }
 0x31e   :  { %v1283_v13 = vadd.f32 %v1282_v11, %v1281_v9  ;;  %v1290_v14 = vrot.slane %v1289_v12, 2 }
 0x320   :  { %v1291_v15 = vadd.f32 %v1290_v14, %v1289_v12  ;;  %v1284_v20 = vrot.slane %v1283_v13, 1 }
 0x322   :  { %v1292_v21 = vrot.slane %v1291_v15, 1  ;;  %v1285_v22 = vadd.f32 %v1284_v20, %v1283_v13 }
 0x324   :  { %v1293_v23 = vadd.f32 %v1292_v21, %v1291_v15  ;;  %v1286_v24 = vmul.f32 0.125, %v1285_v22 }
 0x326   :  { %v1294_v25 = vmul.f32 0.125, %v1293_v23  ;;  %v1295_v26 = vmul.f32 %v1286_v24, %v1286_v24  ;;  %v1298_v30 = vsub.f32 %v1279_v6, %v1286_v24 }
 0x328   :  { %v1296_v27 = vsub.f32 %v1294_v25, %v1295_v26 }
 0x32a   :  { %v1297_v28 = vmax.f32 %v1296_v27, 0.0 }
 0x32c   :  { %v1299_v29 = vadd.f32 1e-05, %v1297_v28 }
 0x32e   :  { %1627 = vrsqrt.f32 %v1299_v29 }
 0x338   :  { %v1628_v31 = vpop.eup %1627 }
 0x339   :  { %v1301_v32 = vmul.f32 %v1628_v31, %v1298_v30 }
 0x33b   :  { %v1302_v33 = vpack.c.bf16 %v1301_v32, %v1301_v32 }
 0x33d   :  { %1542 = vmatmul.mubr.bf16.vlgmr.msra.gmra.mrb[8].mxu0 %v1302_v33 }
 0x410   :  { %v1407_v35 = vpop.f32.mrb[8].mxu0 }
 0x411   :  { %v1408_v36 = vadd.f32 %v1463_v34, %v1407_v35  ;;  %v1543_v37 = vpop.f32.mrb[9].mxu0 }
 0x412   :  { %v1410_v38 = vpop.f32.mrb[10].mxu0 }
 0x413   :  { %1413 = vst [vmem:[#allocation8] sm:$0xff] %v1408_v36  ;;  %v1544_v39 = vpop.f32.mrb[11].mxu0 }
 0x414   :  { %1706 = shalt.err (!%p1703_p0)
}
 0x415   :  { %s1707_s3 = scalar_lea.hbm %s1850_s4, 128 }
 0x416   :  { %p1708_p1 = scmp.ne.s32.totalorder %s1850_s4, %s1707_s3  ;;  %p1711_p2 = scmp.lt.u32.totalorder %s1707_s3, %s1850_s4 }
 0x418   :  { %p1713_p3 = pnand %p1711_p2, %p1708_p1 }
 0x41a   :  { %1716 = shalt.err (!%p1713_p3)
}
 0x41b   :  { %1423 = dma.vmem_to_hbm [thread:$0]  %s1421_s9, 128, %s1850_s4, [#allocation4]  }
 0x41c   :  { %1721 = dma.done.wait [#allocation4], 128  }
 0x41d   :  { %1722 = vsyncadd [#allocation4], 4294967168 }
 0x41e   :  { %1427 = vsyncpa [#allocation3], 1 }
 0x41f   :  { %1428 = vsyncpa [#allocation6], 1 }
 0x420   :  { %1429 = vsyncpa [#allocation4], 1 }

</bundles_post_ra>
